<compile_context>
chip_gen: v6e
topology: v6e:2x2x1
jax: 0.10.0
libtpu: 0.0.40
codegen_flags: <defaults>
</compile_context>

<pallas_src>
import functools
import math

import jax
import jax.numpy as jnp
from jax.experimental import pallas as pl
from jax.experimental.pallas import tpu as pltpu


# ---------------------------------------------------------------------------
# small helpers (layout plumbing, plain JAX on the small tensors only)
# ---------------------------------------------------------------------------
def _round_up(x, m):
    return (x + m - 1) // m * m


def get_winsize(x_size, window_size):
    use = list(window_size)
    for i in range(len(x_size)):
        if x_size[i] <= window_size[i]:
            use[i] = x_size[i]
    return tuple(use)


def _window_partition_nchw(x, ws, pad_b, pad_r, channels_last):
    """(B, C, H, W) -> windows.

    channels_last=True  -> (B*nHb*nWb, ws0*ws1, C)   (mov / matmul lhs)
    channels_last=False -> (B*nHb*nWb, C, ws0*ws1)   (fix / matmul rhs)
    """
    if pad_b or pad_r:
        x = jnp.pad(x, ((0, 0), (0, 0), (0, pad_b), (0, pad_r)))
    B, C, Hp, Wp = x.shape
    x = x.reshape(B, C, Hp // ws[0], ws[0], Wp // ws[1], ws[1])
    if channels_last:
        x = x.transpose(0, 2, 4, 3, 5, 1).reshape(-1, ws[0] * ws[1], C)
    else:
        x = x.transpose(0, 2, 4, 1, 3, 5).reshape(-1, C, ws[0] * ws[1])
    return x, (Hp, Wp)


# ---------------------------------------------------------------------------
# exact (erf-based) GELU in f32.  erf uses the standard f32 rational
# approximation (clamp to [-4,4], x*P(x^2)/Q(x^2)); divide kept exact.
# ---------------------------------------------------------------------------
_ERF_ALPHA = (2.2905065861350646e-04, 3.4082910107109506e-03,
              5.0955695062380861e-02, 1.8520832239976145e-01,
              1.1283791435190840e+00)
_ERF_BETA = (-1.1791602954361697e-07, 2.3547966471313185e-05,
             1.0179625278914885e-03, 1.4070470171167667e-02,
             1.1098505178285362e-01, 4.9746925110067538e-01, 1.0)
_INV_SQRT2 = 1.0 / math.sqrt(2.0)


def _erf_f32(x):
    x = jnp.clip(x, -4.0, 4.0)
    x2 = x * x
    p = _ERF_ALPHA[0]
    for c in _ERF_ALPHA[1:]:
        p = p * x2 + c
    q = _ERF_BETA[0]
    for c in _ERF_BETA[1:]:
        q = q * x2 + c
    return (x * p) / q


def _gelu_exact(x):
    return 0.5 * x * (1.0 + _erf_f32(x * _INV_SQRT2))


# ---------------------------------------------------------------------------
# Pallas kernels
# ---------------------------------------------------------------------------
def _corr_softmax_kernel(x_ref, y_ref, o_ref):
    # x_ref: (WB, N, C) f32 mov windows,  y_ref: (WB, C, N) f32 fix windows.
    # o_ref: (WB, N, N) bf16, o[w, i, j] = softmax_i(<mov_i, fix_j>)
    # i = mov pixel (= cost-volume channel), j = window pixel (spatial), i.e.
    # channels-first windows so the window reverse emits NCHW directly.
    s = jax.lax.dot_general(x_ref[...], y_ref[...],
                            (((2,), (1,)), ((0,), (0,))),
                            preferred_element_type=jnp.float32)      # (WB,N,N)
    m = jnp.max(s, axis=1, keepdims=True)
    e = jnp.exp(s - m)
    r = pl.reciprocal(jnp.sum(e, axis=1, keepdims=True), approx=True)
    o_ref[...] = (e * r).astype(o_ref.dtype)


def _conv3x3_gelu_kernel(mf_ref, cv_ref, wmf_ref, wcv_ref, b_ref, o_ref, *,
                         shifts):
    # mf_ref:  (1, 2C, Lin)   bf16  [mov | fix] channels-first, padded+flat
    # cv_ref:  (1, N,  Lin)   bf16  cost volume, channels-first, padded+flat
    # wmf_ref: (9, Cout, 2C)  bf16  per-tap transposed weights (mov/fix group)
    # wcv_ref: (9, Cout, N)   bf16  per-tap transposed weights (cost volume)
    # b_ref:   (Cout, 1)      f32
    # o_ref:   (1, Cout, Lout) f32, Lout = round_up(H*(W+2), 128) -> lane-dense
    cout = o_ref.shape[1]
    lout = o_ref.shape[2]
    acc = jnp.zeros((cout, lout), jnp.float32)
    for t, s in enumerate(shifts):             # static unroll over 9 taps
        acc = acc + jax.lax.dot_general(
            wcv_ref[t], cv_ref[0, :, s:s + lout],
            (((1,), (0,)), ((), ())), preferred_element_type=jnp.float32)
        acc = acc + jax.lax.dot_general(
            wmf_ref[t], mf_ref[0, :, s:s + lout],
            (((1,), (0,)), ((), ())), preferred_element_type=jnp.float32)
    acc = acc + b_ref[...]
    o_ref[0] = _gelu_exact(acc).astype(o_ref.dtype)


# ---------------------------------------------------------------------------
# Pallas wrappers
# ---------------------------------------------------------------------------
def _correlation_windows(x_win, y_win):
    # x_win: (nW, N, C) f32,  y_win: (nW, C, N) f32  ->  (nW, N, N) bf16
    nW, N, C = x_win.shape
    # Window batch per grid step: largest divisor of nW (no wasted tail work)
    # that keeps >=2 grid steps (megacore) and modest double-buffered VMEM.
    cap = max(1, min(64, nW // 2 if nW > 1 else 1))
    wb = 1
    for d in range(cap, 0, -1):
        if nW % d == 0:
            wb = d
            break
    nWp = nW
    if wb * 8 < min(nW, 64):          # awkward nW (e.g. prime): pad the tail
        wb = 32
        pad = (-nW) % wb
        x_win = jnp.pad(x_win, ((0, pad), (0, 0), (0, 0)))
        y_win = jnp.pad(y_win, ((0, pad), (0, 0), (0, 0)))
        nWp = nW + pad
    out = pl.pallas_call(
        _corr_softmax_kernel,
        out_shape=jax.ShapeDtypeStruct((nWp, N, N), jnp.bfloat16),
        grid=(nWp // wb,),
        in_specs=[pl.BlockSpec((wb, N, C), lambda w: (w, 0, 0)),
                  pl.BlockSpec((wb, C, N), lambda w: (w, 0, 0))],
        out_specs=pl.BlockSpec((wb, N, N), lambda w: (w, 0, 0)),
        compiler_params=pltpu.CompilerParams(
            dimension_semantics=("parallel",)),
    )(x_win, y_win)
    return out[:nW] if nWp != nW else out


# ---------------------------------------------------------------------------
# full forward (matches CorrModule_win.forward)
# ---------------------------------------------------------------------------
def corr_module_forward(mov, fix, conv_w_hwio, conv_b, window_size):
    """mov, fix: (B, C, H, W) f32.  Returns (B, Cout, H, W) f32 (NCHW)."""
    B, C, H, W = mov.shape
    ws = get_winsize((H, W), window_size)
    N = ws[0] * ws[1]
    pad_b = (ws[0] - H % ws[0]) % ws[0]
    pad_r = (ws[1] - W % ws[1]) % ws[1]

    xw, (Hp, Wp) = _window_partition_nchw(mov, ws, pad_b, pad_r, True)
    yw, _ = _window_partition_nchw(fix, ws, pad_b, pad_r, False)
    aff = _correlation_windows(xw, yw)                  # (nW, N, N) bf16

    # ---- conv geometry (3x3 SAME, flattened padded spatial + lane shifts) ---
    Cin = conv_w_hwio.shape[2]
    Cout = conv_w_hwio.shape[3]
    # Like the torch module, the conv expects 2*C + ws0*ws1 input channels.
    assert Cin == 2 * C + N, "conv in-channel mismatch"
    wrow = W + 2
    lflat = (H + 2) * wrow
    lout = _round_up(H * wrow, 128)                 # lane-dense output length
    lin = _round_up(lout + 2 * wrow + 2, 128)       # covers the max tap shift
    shifts = tuple(dy * wrow + dx for dy in range(3) for dx in range(3))

    # Cost volume: window layout -> channels-first NCHW -> 1px zero pad ->
    # flatten; bf16 throughout, one fused XLA layout pass over the big tensor.
    # TODO(synk): emit this padded/flattened NCHW slab straight from the
    # correlation kernel (needs an in-kernel window->row relayout) so the cost
    # volume makes a single HBM round trip.
    cv = aff.reshape(B, Hp // ws[0], Wp // ws[1], N, ws[0], ws[1])
    cv = cv.transpose(0, 3, 1, 4, 2, 5).reshape(B, N, Hp, Wp)[:, :, :H, :W]
    cv = jnp.pad(cv, ((0, 0), (0, 0), (1, 1), (1, 1))).reshape(B, N, lflat)
    cv_flat = jnp.pad(cv, ((0, 0), (0, 0), (0, lin - lflat)))

    # mov/fix slab: only 2*C channels -> cheap XLA prep, no 57-channel concat.
    mf = jnp.concatenate([mov, fix], axis=1).astype(jnp.bfloat16)
    mf = jnp.pad(mf, ((0, 0), (0, 0), (1, 1), (1, 1))).reshape(B, 2 * C, lflat)
    mf_flat = jnp.pad(mf, ((0, 0), (0, 0), (0, lin - lflat)))

    # Per-tap transposed weights, split by channel group [mov | cv | fix].
    w_t = jnp.transpose(conv_w_hwio, (0, 1, 3, 2)).reshape(9, Cout, Cin)
    w_mf = jnp.concatenate([w_t[:, :, :C], w_t[:, :, C + N:]], axis=-1)
    w_mf = w_mf.astype(jnp.bfloat16)
    w_cv = w_t[:, :, C:C + N].astype(jnp.bfloat16)
    b2 = conv_b.astype(jnp.float32).reshape(Cout, 1)

    # TODO(synk): for large H*W, tile the flattened spatial axis across the
    # grid (with a 2*(W+2)+2 halo per tile) instead of one image per step.
    out = pl.pallas_call(
        functools.partial(_conv3x3_gelu_kernel, shifts=shifts),
        out_shape=jax.ShapeDtypeStruct((B, Cout, lout), jnp.float32),
        grid=(B,),
        in_specs=[pl.BlockSpec((1, 2 * C, lin), lambda b: (b, 0, 0)),
                  pl.BlockSpec((1, N, lin), lambda b: (b, 0, 0)),
                  pl.BlockSpec((9, Cout, 2 * C), lambda b: (0, 0, 0)),
                  pl.BlockSpec((9, Cout, N), lambda b: (0, 0, 0)),
                  pl.BlockSpec((Cout, 1), lambda b: (0, 0))],
        out_specs=pl.BlockSpec((1, Cout, lout), lambda b: (b, 0, 0)),
        compiler_params=pltpu.CompilerParams(
            dimension_semantics=("parallel",),
            vmem_limit_bytes=32 * 1024 * 1024),
    )(mf_flat, cv_flat, w_mf, w_cv, b2)
    # drop junk right-border columns and lane padding -> already NCHW
    return out[:, :, :H * wrow].reshape(B, Cout, H, wrow)[:, :, :, :W]


# ---------------------------------------------------------------------------
# pure-JAX reference (straight port of the PyTorch math) for a sanity check
# ---------------------------------------------------------------------------
def _reference_forward(mov, fix, conv_w_hwio, conv_b, window_size):
    b, c, h, w = mov.shape
    x = jnp.transpose(mov, (0, 2, 3, 1))
    y = jnp.transpose(fix, (0, 2, 3, 1))
    ws = get_winsize((h, w), window_size)
    pad_b = (ws[0] - h % ws[0]) % ws[0]
    pad_r = (ws[1] - w % ws[1]) % ws[1]
    if pad_b or pad_r:
        x = jnp.pad(x, ((0, 0), (0, pad_b), (0, pad_r), (0, 0)))
        y = jnp.pad(y, ((0, 0), (0, pad_b), (0, pad_r), (0, 0)))
    hp, wp = x.shape[1], x.shape[2]

    def part(t):
        t = t.reshape(b, hp // ws[0], ws[0], wp // ws[1], ws[1], c)
        return t.transpose(0, 1, 3, 2, 4, 5).reshape(-1, ws[0] * ws[1], c)

    xw, yw = part(x), part(y)
    aff = jnp.einsum('bic,bjc->bij', xw, yw,
                     precision=jax.lax.Precision.HIGHEST)
    aff = jax.nn.softmax(aff, axis=1)
    aff = jnp.transpose(aff, (0, 2, 1))
    aff = aff.reshape(-1, ws[0], ws[1], ws[0] * ws[1])
    aff = aff.reshape(b, hp // ws[0], wp // ws[1], ws[0], ws[1], ws[0] * ws[1])
    cv = aff.transpose(0, 1, 3, 2, 4, 5).reshape(b, hp, wp, ws[0] * ws[1])
    cv = cv[:, :h, :w, :]
    xin = jnp.concatenate([jnp.transpose(mov, (0, 2, 3, 1)), cv,
                           jnp.transpose(fix, (0, 2, 3, 1))], axis=-1)
    z = jax.lax.conv_general_dilated(
        xin, conv_w_hwio, window_strides=(1, 1), padding='SAME',
        dimension_numbers=('NHWC', 'HWIO', 'NHWC'),
        precision=jax.lax.Precision.HIGHEST) + conv_b
    g = 0.5 * z * (1.0 + jax.scipy.special.erf(z / math.sqrt(2.0)))
    return jnp.transpose(g, (0, 3, 1, 2))


# ---------------------------------------------------------------------------
if __name__ == "__main__":
    channel_num = 4
    window_size = (7, 7)
    B, H, W = 2, 14, 14

    key = jax.random.PRNGKey(0)
    k_mov, k_fix, k_w, k_b = jax.random.split(key, 4)
    mov = jax.random.normal(k_mov, (B, channel_num, H, W), jnp.float32)
    fix = jax.random.normal(k_fix, (B, channel_num, H, W), jnp.float32)

    # ConvAct params: Conv2d(2*C + ws0*ws1 -> C, k=3, s=1, p=1), weight HWIO.
    cin = 2 * channel_num + window_size[0] * window_size[1]
    cout = channel_num
    bound = 1.0 / math.sqrt(cin * 9)
    conv_w = jax.random.uniform(k_w, (3, 3, cin, cout), jnp.float32,
                                -bound, bound)
    conv_b = jax.random.uniform(k_b, (cout,), jnp.float32, -bound, bound)

    fwd = jax.jit(lambda m, f, w, bb: corr_module_forward(m, f, w, bb,
                                                          window_size))
    out = jax.block_until_ready(fwd(mov, fix, conv_w, conv_b))

    assert out.shape == (B, channel_num, H, W), out.shape
    assert bool(jnp.all(jnp.isfinite(out)))

    ref = _reference_forward(mov, fix, conv_w, conv_b, window_size)
    max_err = float(jnp.max(jnp.abs(out - ref)))
    assert max_err < 2e-2, f"max abs error vs reference = {max_err}"

    print("KERNEL_OK")
</pallas_src>

<mosaic_0001>
module attributes {stable_mosaic.version = 11 : i64} {
  func.func @_corr_softmax_kernel(%arg0: i32, %arg1: memref<4x49x4xf32, #tpu.memory_space<vmem>>, %arg2: memref<4x4x49xf32, #tpu.memory_space<vmem>>, %arg3: memref<4x49x49xbf16, #tpu.memory_space<vmem>>) attributes {dimension_semantics = [#tpu.dimension_semantics<parallel>], iteration_bounds = array<i64: 2>, scalar_prefetch = 0 : i64, scratch_operands = 0 : i64, tpu.core_type = #tpu.core_type<tc>, window_params = [{transform_indices = @transform_0, window_bounds = array<i64: 4, 49, 4>}, {transform_indices = @transform_1, window_bounds = array<i64: 4, 4, 49>}, {transform_indices = @transform_2, window_bounds = array<i64: 4, 49, 49>}]} {
    %c0 = arith.constant 0 : index
    %c0_0 = arith.constant 0 : index
    %c0_1 = arith.constant 0 : index
    %0 = vector.load %arg1[%c0, %c0_0, %c0_1] : memref<4x49x4xf32, #tpu.memory_space<vmem>>, vector<4x49x4xf32>
    %c0_2 = arith.constant 0 : index
    %c0_3 = arith.constant 0 : index
    %c0_4 = arith.constant 0 : index
    %1 = vector.load %arg2[%c0_2, %c0_3, %c0_4] : memref<4x4x49xf32, #tpu.memory_space<vmem>>, vector<4x4x49xf32>
    %cst = arith.constant dense<0.000000e+00> : vector<4x49x49xf32>
    %2 = tpu.matmul %0, %1, %cst {dimension_numbers = #tpu.dot_dimension_numbers<[2], [1], [1], [2], [0, 0, 0, 1, 1, 2], [0], [0]>} : vector<4x49x4xf32>, vector<4x4x49xf32>, vector<4x49x49xf32> -> vector<4x49x49xf32>
    %cst_5 = arith.constant dense<0xFF800000> : vector<4x49xf32>
    %3 = vector.multi_reduction <maximumf>, %2, %cst_5 [1] : vector<4x49x49xf32> to vector<4x49xf32>
    %4 = vector.shape_cast %3 : vector<4x49xf32> to vector<4x1x49xf32>
    %5 = vector.broadcast %4 : vector<4x1x49xf32> to vector<4x49x49xf32>
    %6 = arith.subf %2, %5 : vector<4x49x49xf32>
    %7 = math.exp %6 : vector<4x49x49xf32>
    %cst_6 = arith.constant dense<0.000000e+00> : vector<4x49xf32>
    %8 = vector.multi_reduction <add>, %7, %cst_6 [1] : vector<4x49x49xf32> to vector<4x49xf32>
    %9 = vector.shape_cast %8 : vector<4x49xf32> to vector<4x1x49xf32>
    %10 = tpu.reciprocal %9 {approx = true} : vector<4x1x49xf32> -> vector<4x1x49xf32>
    %11 = vector.broadcast %10 : vector<4x1x49xf32> to vector<4x49x49xf32>
    %12 = arith.mulf %7, %11 : vector<4x49x49xf32>
    %13 = arith.truncf %12 : vector<4x49x49xf32> to vector<4x49x49xbf16>
    %c0_7 = arith.constant 0 : index
    %c0_8 = arith.constant 0 : index
    %c0_9 = arith.constant 0 : index
    %14 = vector.load %arg3[%c0_7, %c0_8, %c0_9] : memref<4x49x49xbf16, #tpu.memory_space<vmem>>, vector<4x49x49xbf16>
    tpu.vector_store %arg3[%c0_7, %c0_8, %c0_9], %13 {strides = array<i32>} : memref<4x49x49xbf16, #tpu.memory_space<vmem>>, vector<4x49x49xbf16>,
    return
  }
  func.func @transform_0(%arg0: i32) -> (i32, i32, i32) {
    %c0_i32 = arith.constant 0 : i32
    %c0_i32_0 = arith.constant 0 : i32
    %c0_i32_1 = arith.constant 0 : i32
    return %arg0, %c0_i32, %c0_i32_0 : i32, i32, i32
  }
  func.func @transform_1(%arg0: i32) -> (i32, i32, i32) {
    %c0_i32 = arith.constant 0 : i32
    %c0_i32_0 = arith.constant 0 : i32
    %c0_i32_1 = arith.constant 0 : i32
    return %arg0, %c0_i32, %c0_i32_0 : i32, i32, i32
  }
  func.func @transform_2(%arg0: i32) -> (i32, i32, i32) {
    %c0_i32 = arith.constant 0 : i32
    %c0_i32_0 = arith.constant 0 : i32
    %c0_i32_1 = arith.constant 0 : i32
    return %arg0, %c0_i32, %c0_i32_0 : i32, i32, i32
  }
}

module attributes {stable_mosaic.version = 11 : i64} {
  func.func @_conv3x3_gelu_kernel(%arg0: i32, %arg1: memref<1x8x384xbf16, #tpu.memory_space<vmem>>, %arg2: memref<1x49x384xbf16, #tpu.memory_space<vmem>>, %arg3: memref<9x4x8xbf16, #tpu.memory_space<vmem>>, %arg4: memref<9x4x49xbf16, #tpu.memory_space<vmem>>, %arg5: memref<4x1xf32, #tpu.memory_space<vmem>>, %arg6: memref<1x4x256xf32, #tpu.memory_space<vmem>>) attributes {dimension_semantics = [#tpu.dimension_semantics<parallel>], iteration_bounds = array<i64: 2>, scalar_prefetch = 0 : i64, scratch_operands = 0 : i64, tpu.core_type = #tpu.core_type<tc>, window_params = [{transform_indices = @transform_0, window_bounds = array<i64: 1, 8, 384>}, {transform_indices = @transform_1, window_bounds = array<i64: 1, 49, 384>}, {pipeline_mode = #tpu.pipeline_mode<synchronous>, transform_indices = @transform_2, window_bounds = array<i64: 9, 4, 8>}, {pipeline_mode = #tpu.pipeline_mode<synchronous>, transform_indices = @transform_3, window_bounds = array<i64: 9, 4, 49>}, {pipeline_mode = #tpu.pipeline_mode<synchronous>, transform_indices = @transform_4, window_bounds = array<i64: 4, 1>}, {transform_indices = @transform_5, window_bounds = array<i64: 1, 4, 256>}]} {
    %cst = arith.constant 0.000000e+00 : f32
    %0 = vector.broadcast %cst : f32 to vector<4x256xf32>
    %c0 = arith.constant 0 : index
    %c0_0 = arith.constant 0 : index
    %c0_1 = arith.constant 0 : index
    %1 = vector.load %arg4[%c0, %c0_0, %c0_1] : memref<9x4x49xbf16, #tpu.memory_space<vmem>>, vector<1x4x49xbf16>
    %2 = vector.shape_cast %1 : vector<1x4x49xbf16> to vector<4x49xbf16>
    %c0_2 = arith.constant 0 : index
    %c0_3 = arith.constant 0 : index
    %c0_4 = arith.constant 0 : index
    %3 = vector.load %arg2[%c0_2, %c0_3, %c0_4] : memref<1x49x384xbf16, #tpu.memory_space<vmem>>, vector<1x49x256xbf16>
    %4 = vector.shape_cast %3 : vector<1x49x256xbf16> to vector<49x256xbf16>
    %cst_5 = arith.constant dense<0.000000e+00> : vector<4x256xf32>
    %5 = tpu.matmul %2, %4, %cst_5 {dimension_numbers = #tpu.dot_dimension_numbers<[1], [0], [0], [1], [0, 0, 1, 1], [], []>} : vector<4x49xbf16>, vector<49x256xbf16>, vector<4x256xf32> -> vector<4x256xf32>
    %6 = arith.addf %0, %5 : vector<4x256xf32>
    %c0_6 = arith.constant 0 : index
    %c0_7 = arith.constant 0 : index
    %c0_8 = arith.constant 0 : index
    %7 = vector.load %arg3[%c0_6, %c0_7, %c0_8] : memref<9x4x8xbf16, #tpu.memory_space<vmem>>, vector<1x4x8xbf16>
    %8 = vector.shape_cast %7 : vector<1x4x8xbf16> to vector<4x8xbf16>
    %c0_9 = arith.constant 0 : index
    %c0_10 = arith.constant 0 : index
    %c0_11 = arith.constant 0 : index
    %9 = vector.load %arg1[%c0_9, %c0_10, %c0_11] : memref<1x8x384xbf16, #tpu.memory_space<vmem>>, vector<1x8x256xbf16>
    %10 = vector.shape_cast %9 : vector<1x8x256xbf16> to vector<8x256xbf16>
    %cst_12 = arith.constant dense<0.000000e+00> : vector<4x256xf32>
    %11 = tpu.matmul %8, %10, %cst_12 {dimension_numbers = #tpu.dot_dimension_numbers<[1], [0], [0], [1], [0, 0, 1, 1], [], []>} : vector<4x8xbf16>, vector<8x256xbf16>, vector<4x256xf32> -> vector<4x256xf32>
    %12 = arith.addf %6, %11 : vector<4x256xf32>
    %c1 = arith.constant 1 : index
    %c0_13 = arith.constant 0 : index
    %c0_14 = arith.constant 0 : index
    %13 = vector.load %arg4[%c1, %c0_13, %c0_14] : memref<9x4x49xbf16, #tpu.memory_space<vmem>>, vector<1x4x49xbf16>
    %14 = vector.shape_cast %13 : vector<1x4x49xbf16> to vector<4x49xbf16>
    %c0_15 = arith.constant 0 : index
    %c0_16 = arith.constant 0 : index
    %c1_17 = arith.constant 1 : index
    %15 = vector.load %arg2[%c0_15, %c0_16, %c1_17] : memref<1x49x384xbf16, #tpu.memory_space<vmem>>, vector<1x49x256xbf16>
    %16 = vector.shape_cast %15 : vector<1x49x256xbf16> to vector<49x256xbf16>
    %cst_18 = arith.constant dense<0.000000e+00> : vector<4x256xf32>
    %17 = tpu.matmul %14, %16, %cst_18 {dimension_numbers = #tpu.dot_dimension_numbers<[1], [0], [0], [1], [0, 0, 1, 1], [], []>} : vector<4x49xbf16>, vector<49x256xbf16>, vector<4x256xf32> -> vector<4x256xf32>
    %18 = arith.addf %12, %17 : vector<4x256xf32>
    %c1_19 = arith.constant 1 : index
    %c0_20 = arith.constant 0 : index
    %c0_21 = arith.constant 0 : index
    %19 = vector.load %arg3[%c1_19, %c0_20, %c0_21] : memref<9x4x8xbf16, #tpu.memory_space<vmem>>, vector<1x4x8xbf16>
    %20 = vector.shape_cast %19 : vector<1x4x8xbf16> to vector<4x8xbf16>
    %c0_22 = arith.constant 0 : index
    %c0_23 = arith.constant 0 : index
    %c1_24 = arith.constant 1 : index
    %21 = vector.load %arg1[%c0_22, %c0_23, %c1_24] : memref<1x8x384xbf16, #tpu.memory_space<vmem>>, vector<1x8x256xbf16>
    %22 = vector.shape_cast %21 : vector<1x8x256xbf16> to vector<8x256xbf16>
    %cst_25 = arith.constant dense<0.000000e+00> : vector<4x256xf32>
    %23 = tpu.matmul %20, %22, %cst_25 {dimension_numbers = #tpu.dot_dimension_numbers<[1], [0], [0], [1], [0, 0, 1, 1], [], []>} : vector<4x8xbf16>, vector<8x256xbf16>, vector<4x256xf32> -> vector<4x256xf32>
    %24 = arith.addf %18, %23 : vector<4x256xf32>
    %c2 = arith.constant 2 : index
    %c0_26 = arith.constant 0 : index
    %c0_27 = arith.constant 0 : index
    %25 = vector.load %arg4[%c2, %c0_26, %c0_27] : memref<9x4x49xbf16, #tpu.memory_space<vmem>>, vector<1x4x49xbf16>
    %26 = vector.shape_cast %25 : vector<1x4x49xbf16> to vector<4x49xbf16>
    %c0_28 = arith.constant 0 : index
    %c0_29 = arith.constant 0 : index
    %c2_30 = arith.constant 2 : index
    %27 = vector.load %arg2[%c0_28, %c0_29, %c2_30] : memref<1x49x384xbf16, #tpu.memory_space<vmem>>, vector<1x49x256xbf16>
    %28 = vector.shape_cast %27 : vector<1x49x256xbf16> to vector<49x256xbf16>
    %cst_31 = arith.constant dense<0.000000e+00> : vector<4x256xf32>
    %29 = tpu.matmul %26, %28, %cst_31 {dimension_numbers = #tpu.dot_dimension_numbers<[1], [0], [0], [1], [0, 0, 1, 1], [], []>} : vector<4x49xbf16>, vector<49x256xbf16>, vector<4x256xf32> -> vector<4x256xf32>
    %30 = arith.addf %24, %29 : vector<4x256xf32>
    %c2_32 = arith.constant 2 : index
    %c0_33 = arith.constant 0 : index
    %c0_34 = arith.constant 0 : index
    %31 = vector.load %arg3[%c2_32, %c0_33, %c0_34] : memref<9x4x8xbf16, #tpu.memory_space<vmem>>, vector<1x4x8xbf16>
    %32 = vector.shape_cast %31 : vector<1x4x8xbf16> to vector<4x8xbf16>
    %c0_35 = arith.constant 0 : index
    %c0_36 = arith.constant 0 : index
    %c2_37 = arith.constant 2 : index
    %33 = vector.load %arg1[%c0_35, %c0_36, %c2_37] : memref<1x8x384xbf16, #tpu.memory_space<vmem>>, vector<1x8x256xbf16>
    %34 = vector.shape_cast %33 : vector<1x8x256xbf16> to vector<8x256xbf16>
    %cst_38 = arith.constant dense<0.000000e+00> : vector<4x256xf32>
    %35 = tpu.matmul %32, %34, %cst_38 {dimension_numbers = #tpu.dot_dimension_numbers<[1], [0], [0], [1], [0, 0, 1, 1], [], []>} : vector<4x8xbf16>, vector<8x256xbf16>, vector<4x256xf32> -> vector<4x256xf32>
    %36 = arith.addf %30, %35 : vector<4x256xf32>
    %c3 = arith.constant 3 : index
    %c0_39 = arith.constant 0 : index
    %c0_40 = arith.constant 0 : index
    %37 = vector.load %arg4[%c3, %c0_39, %c0_40] : memref<9x4x49xbf16, #tpu.memory_space<vmem>>, vector<1x4x49xbf16>
    %38 = vector.shape_cast %37 : vector<1x4x49xbf16> to vector<4x49xbf16>
    %c0_41 = arith.constant 0 : index
    %c0_42 = arith.constant 0 : index
    %c16 = arith.constant 16 : index
    %39 = vector.load %arg2[%c0_41, %c0_42, %c16] : memref<1x49x384xbf16, #tpu.memory_space<vmem>>, vector<1x49x256xbf16>
    %40 = vector.shape_cast %39 : vector<1x49x256xbf16> to vector<49x256xbf16>
    %cst_43 = arith.constant dense<0.000000e+00> : vector<4x256xf32>
    %41 = tpu.matmul %38, %40, %cst_43 {dimension_numbers = #tpu.dot_dimension_numbers<[1], [0], [0], [1], [0, 0, 1, 1], [], []>} : vector<4x49xbf16>, vector<49x256xbf16>, vector<4x256xf32> -> vector<4x256xf32>
    %42 = arith.addf %36, %41 : vector<4x256xf32>
    %c3_44 = arith.constant 3 : index
    %c0_45 = arith.constant 0 : index
    %c0_46 = arith.constant 0 : index
    %43 = vector.load %arg3[%c3_44, %c0_45, %c0_46] : memref<9x4x8xbf16, #tpu.memory_space<vmem>>, vector<1x4x8xbf16>
    %44 = vector.shape_cast %43 : vector<1x4x8xbf16> to vector<4x8xbf16>
    %c0_47 = arith.constant 0 : index
    %c0_48 = arith.constant 0 : index
    %c16_49 = arith.constant 16 : index
    %45 = vector.load %arg1[%c0_47, %c0_48, %c16_49] : memref<1x8x384xbf16, #tpu.memory_space<vmem>>, vector<1x8x256xbf16>
    %46 = vector.shape_cast %45 : vector<1x8x256xbf16> to vector<8x256xbf16>
    %cst_50 = arith.constant dense<0.000000e+00> : vector<4x256xf32>
    %47 = tpu.matmul %44, %46, %cst_50 {dimension_numbers = #tpu.dot_dimension_numbers<[1], [0], [0], [1], [0, 0, 1, 1], [], []>} : vector<4x8xbf16>, vector<8x256xbf16>, vector<4x256xf32> -> vector<4x256xf32>
    %48 = arith.addf %42, %47 : vector<4x256xf32>
    %c4 = arith.constant 4 : index
    %c0_51 = arith.constant 0 : index
    %c0_52 = arith.constant 0 : index
    %49 = vector.load %arg4[%c4, %c0_51, %c0_52] : memref<9x4x49xbf16, #tpu.memory_space<vmem>>, vector<1x4x49xbf16>
    %50 = vector.shape_cast %49 : vector<1x4x49xbf16> to vector<4x49xbf16>
    %c0_53 = arith.constant 0 : index
    %c0_54 = arith.constant 0 : index
    %c17 = arith.constant 17 : index
    %51 = vector.load %arg2[%c0_53, %c0_54, %c17] : memref<1x49x384xbf16, #tpu.memory_space<vmem>>, vector<1x49x256xbf16>
    %52 = vector.shape_cast %51 : vector<1x49x256xbf16> to vector<49x256xbf16>
    %cst_55 = arith.constant dense<0.000000e+00> : vector<4x256xf32>
    %53 = tpu.matmul %50, %52, %cst_55 {dimension_numbers = #tpu.dot_dimension_numbers<[1], [0], [0], [1], [0, 0, 1, 1], [], []>} : vector<4x49xbf16>, vector<49x256xbf16>, vector<4x256xf32> -> vector<4x256xf32>
    %54 = arith.addf %48, %53 : vector<4x256xf32>
    %c4_56 = arith.constant 4 : index
    %c0_57 = arith.constant 0 : index
    %c0_58 = arith.constant 0 : index
    %55 = vector.load %arg3[%c4_56, %c0_57, %c0_58] : memref<9x4x8xbf16, #tpu.memory_space<vmem>>, vector<1x4x8xbf16>
    %56 = vector.shape_cast %55 : vector<1x4x8xbf16> to vector<4x8xbf16>
    %c0_59 = arith.constant 0 : index
    %c0_60 = arith.constant 0 : index
    %c17_61 = arith.constant 17 : index
    %57 = vector.load %arg1[%c0_59, %c0_60, %c17_61] : memref<1x8x384xbf16, #tpu.memory_space<vmem>>, vector<1x8x256xbf16>
    %58 = vector.shape_cast %57 : vector<1x8x256xbf16> to vector<8x256xbf16>
    %cst_62 = arith.constant dense<0.000000e+00> : vector<4x256xf32>
    %59 = tpu.matmul %56, %58, %cst_62 {dimension_numbers = #tpu.dot_dimension_numbers<[1], [0], [0], [1], [0, 0, 1, 1], [], []>} : vector<4x8xbf16>, vector<8x256xbf16>, vector<4x256xf32> -> vector<4x256xf32>
    %60 = arith.addf %54, %59 : vector<4x256xf32>
    %c5 = arith.constant 5 : index
    %c0_63 = arith.constant 0 : index
    %c0_64 = arith.constant 0 : index
    %61 = vector.load %arg4[%c5, %c0_63, %c0_64] : memref<9x4x49xbf16, #tpu.memory_space<vmem>>, vector<1x4x49xbf16>
    %62 = vector.shape_cast %61 : vector<1x4x49xbf16> to vector<4x49xbf16>
    %c0_65 = arith.constant 0 : index
    %c0_66 = arith.constant 0 : index
    %c18 = arith.constant 18 : index
    %63 = vector.load %arg2[%c0_65, %c0_66, %c18] : memref<1x49x384xbf16, #tpu.memory_space<vmem>>, vector<1x49x256xbf16>
    %64 = vector.shape_cast %63 : vector<1x49x256xbf16> to vector<49x256xbf16>
    %cst_67 = arith.constant dense<0.000000e+00> : vector<4x256xf32>
    %65 = tpu.matmul %62, %64, %cst_67 {dimension_numbers = #tpu.dot_dimension_numbers<[1], [0], [0], [1], [0, 0, 1, 1], [], []>} : vector<4x49xbf16>, vector<49x256xbf16>, vector<4x256xf32> -> vector<4x256xf32>
    %66 = arith.addf %60, %65 : vector<4x256xf32>
    %c5_68 = arith.constant 5 : index
    %c0_69 = arith.constant 0 : index
    %c0_70 = arith.constant 0 : index
    %67 = vector.load %arg3[%c5_68, %c0_69, %c0_70] : memref<9x4x8xbf16, #tpu.memory_space<vmem>>, vector<1x4x8xbf16>
    %68 = vector.shape_cast %67 : vector<1x4x8xbf16> to vector<4x8xbf16>
    %c0_71 = arith.constant 0 : index
    %c0_72 = arith.constant 0 : index
    %c18_73 = arith.constant 18 : index
    %69 = vector.load %arg1[%c0_71, %c0_72, %c18_73] : memref<1x8x384xbf16, #tpu.memory_space<vmem>>, vector<1x8x256xbf16>
    %70 = vector.shape_cast %69 : vector<1x8x256xbf16> to vector<8x256xbf16>
    %cst_74 = arith.constant dense<0.000000e+00> : vector<4x256xf32>
    %71 = tpu.matmul %68, %70, %cst_74 {dimension_numbers = #tpu.dot_dimension_numbers<[1], [0], [0], [1], [0, 0, 1, 1], [], []>} : vector<4x8xbf16>, vector<8x256xbf16>, vector<4x256xf32> -> vector<4x256xf32>
    %72 = arith.addf %66, %71 : vector<4x256xf32>
    %c6 = arith.constant 6 : index
    %c0_75 = arith.constant 0 : index
    %c0_76 = arith.constant 0 : index
    %73 = vector.load %arg4[%c6, %c0_75, %c0_76] : memref<9x4x49xbf16, #tpu.memory_space<vmem>>, vector<1x4x49xbf16>
    %74 = vector.shape_cast %73 : vector<1x4x49xbf16> to vector<4x49xbf16>
    %c0_77 = arith.constant 0 : index
    %c0_78 = arith.constant 0 : index
    %c32 = arith.constant 32 : index
    %75 = vector.load %arg2[%c0_77, %c0_78, %c32] : memref<1x49x384xbf16, #tpu.memory_space<vmem>>, vector<1x49x256xbf16>
    %76 = vector.shape_cast %75 : vector<1x49x256xbf16> to vector<49x256xbf16>
    %cst_79 = arith.constant dense<0.000000e+00> : vector<4x256xf32>
    %77 = tpu.matmul %74, %76, %cst_79 {dimension_numbers = #tpu.dot_dimension_numbers<[1], [0], [0], [1], [0, 0, 1, 1], [], []>} : vector<4x49xbf16>, vector<49x256xbf16>, vector<4x256xf32> -> vector<4x256xf32>
    %78 = arith.addf %72, %77 : vector<4x256xf32>
    %c6_80 = arith.constant 6 : index
    %c0_81 = arith.constant 0 : index
    %c0_82 = arith.constant 0 : index
    %79 = vector.load %arg3[%c6_80, %c0_81, %c0_82] : memref<9x4x8xbf16, #tpu.memory_space<vmem>>, vector<1x4x8xbf16>
    %80 = vector.shape_cast %79 : vector<1x4x8xbf16> to vector<4x8xbf16>
    %c0_83 = arith.constant 0 : index
    %c0_84 = arith.constant 0 : index
    %c32_85 = arith.constant 32 : index
    %81 = vector.load %arg1[%c0_83, %c0_84, %c32_85] : memref<1x8x384xbf16, #tpu.memory_space<vmem>>, vector<1x8x256xbf16>
    %82 = vector.shape_cast %81 : vector<1x8x256xbf16> to vector<8x256xbf16>
    %cst_86 = arith.constant dense<0.000000e+00> : vector<4x256xf32>
    %83 = tpu.matmul %80, %82, %cst_86 {dimension_numbers = #tpu.dot_dimension_numbers<[1], [0], [0], [1], [0, 0, 1, 1], [], []>} : vector<4x8xbf16>, vector<8x256xbf16>, vector<4x256xf32> -> vector<4x256xf32>
    %84 = arith.addf %78, %83 : vector<4x256xf32>
    %c7 = arith.constant 7 : index
    %c0_87 = arith.constant 0 : index
    %c0_88 = arith.constant 0 : index
    %85 = vector.load %arg4[%c7, %c0_87, %c0_88] : memref<9x4x49xbf16, #tpu.memory_space<vmem>>, vector<1x4x49xbf16>
    %86 = vector.shape_cast %85 : vector<1x4x49xbf16> to vector<4x49xbf16>
    %c0_89 = arith.constant 0 : index
    %c0_90 = arith.constant 0 : index
    %c33 = arith.constant 33 : index
    %87 = vector.load %arg2[%c0_89, %c0_90, %c33] : memref<1x49x384xbf16, #tpu.memory_space<vmem>>, vector<1x49x256xbf16>
    %88 = vector.shape_cast %87 : vector<1x49x256xbf16> to vector<49x256xbf16>
    %cst_91 = arith.constant dense<0.000000e+00> : vector<4x256xf32>
    %89 = tpu.matmul %86, %88, %cst_91 {dimension_numbers = #tpu.dot_dimension_numbers<[1], [0], [0], [1], [0, 0, 1, 1], [], []>} : vector<4x49xbf16>, vector<49x256xbf16>, vector<4x256xf32> -> vector<4x256xf32>
    %90 = arith.addf %84, %89 : vector<4x256xf32>
    %c7_92 = arith.constant 7 : index
    %c0_93 = arith.constant 0 : index
    %c0_94 = arith.constant 0 : index
    %91 = vector.load %arg3[%c7_92, %c0_93, %c0_94] : memref<9x4x8xbf16, #tpu.memory_space<vmem>>, vector<1x4x8xbf16>
    %92 = vector.shape_cast %91 : vector<1x4x8xbf16> to vector<4x8xbf16>
    %c0_95 = arith.constant 0 : index
    %c0_96 = arith.constant 0 : index
    %c33_97 = arith.constant 33 : index
    %93 = vector.load %arg1[%c0_95, %c0_96, %c33_97] : memref<1x8x384xbf16, #tpu.memory_space<vmem>>, vector<1x8x256xbf16>
    %94 = vector.shape_cast %93 : vector<1x8x256xbf16> to vector<8x256xbf16>
    %cst_98 = arith.constant dense<0.000000e+00> : vector<4x256xf32>
    %95 = tpu.matmul %92, %94, %cst_98 {dimension_numbers = #tpu.dot_dimension_numbers<[1], [0], [0], [1], [0, 0, 1, 1], [], []>} : vector<4x8xbf16>, vector<8x256xbf16>, vector<4x256xf32> -> vector<4x256xf32>
    %96 = arith.addf %90, %95 : vector<4x256xf32>
    %c8 = arith.constant 8 : index
    %c0_99 = arith.constant 0 : index
    %c0_100 = arith.constant 0 : index
    %97 = vector.load %arg4[%c8, %c0_99, %c0_100] : memref<9x4x49xbf16, #tpu.memory_space<vmem>>, vector<1x4x49xbf16>
    %98 = vector.shape_cast %97 : vector<1x4x49xbf16> to vector<4x49xbf16>
    %c0_101 = arith.constant 0 : index
    %c0_102 = arith.constant 0 : index
    %c34 = arith.constant 34 : index
    %99 = vector.load %arg2[%c0_101, %c0_102, %c34] : memref<1x49x384xbf16, #tpu.memory_space<vmem>>, vector<1x49x256xbf16>
    %100 = vector.shape_cast %99 : vector<1x49x256xbf16> to vector<49x256xbf16>
    %cst_103 = arith.constant dense<0.000000e+00> : vector<4x256xf32>
    %101 = tpu.matmul %98, %100, %cst_103 {dimension_numbers = #tpu.dot_dimension_numbers<[1], [0], [0], [1], [0, 0, 1, 1], [], []>} : vector<4x49xbf16>, vector<49x256xbf16>, vector<4x256xf32> -> vector<4x256xf32>
    %102 = arith.addf %96, %101 : vector<4x256xf32>
    %c8_104 = arith.constant 8 : index
    %c0_105 = arith.constant 0 : index
    %c0_106 = arith.constant 0 : index
    %103 = vector.load %arg3[%c8_104, %c0_105, %c0_106] : memref<9x4x8xbf16, #tpu.memory_space<vmem>>, vector<1x4x8xbf16>
    %104 = vector.shape_cast %103 : vector<1x4x8xbf16> to vector<4x8xbf16>
    %c0_107 = arith.constant 0 : index
    %c0_108 = arith.constant 0 : index
    %c34_109 = arith.constant 34 : index
    %105 = vector.load %arg1[%c0_107, %c0_108, %c34_109] : memref<1x8x384xbf16, #tpu.memory_space<vmem>>, vector<1x8x256xbf16>
    %106 = vector.shape_cast %105 : vector<1x8x256xbf16> to vector<8x256xbf16>
    %cst_110 = arith.constant dense<0.000000e+00> : vector<4x256xf32>
    %107 = tpu.matmul %104, %106, %cst_110 {dimension_numbers = #tpu.dot_dimension_numbers<[1], [0], [0], [1], [0, 0, 1, 1], [], []>} : vector<4x8xbf16>, vector<8x256xbf16>, vector<4x256xf32> -> vector<4x256xf32>
    %108 = arith.addf %102, %107 : vector<4x256xf32>
    %c0_111 = arith.constant 0 : index
    %c0_112 = arith.constant 0 : index
    %109 = vector.load %arg5[%c0_111, %c0_112] : memref<4x1xf32, #tpu.memory_space<vmem>>, vector<4x1xf32>
    %110 = vector.broadcast %109 : vector<4x1xf32> to vector<4x256xf32>
    %111 = arith.addf %108, %110 : vector<4x256xf32>
    %cst_113 = arith.constant 5.000000e-01 : f32
    %112 = vector.broadcast %cst_113 : f32 to vector<4x256xf32>
    %113 = arith.mulf %112, %111 : vector<4x256xf32>
    %cst_114 = arith.constant 0.707106769 : f32
    %114 = vector.broadcast %cst_114 : f32 to vector<4x256xf32>
    %115 = arith.mulf %111, %114 : vector<4x256xf32>
    %cst_115 = arith.constant -4.000000e+00 : f32
    %cst_116 = arith.constant 4.000000e+00 : f32
    %116 = vector.broadcast %cst_115 : f32 to vector<4x256xf32>
    %117 = arith.maximumf %116, %115 : vector<4x256xf32>
    %118 = vector.broadcast %cst_116 : f32 to vector<4x256xf32>
    %119 = arith.minimumf %118, %117 : vector<4x256xf32>
    %120 = arith.mulf %119, %119 : vector<4x256xf32>
    %cst_117 = arith.constant 2.29050653E-4 : f32
    %121 = vector.broadcast %cst_117 : f32 to vector<4x256xf32>
    %122 = arith.mulf %121, %120 : vector<4x256xf32>
    %cst_118 = arith.constant 0.00340829091 : f32
    %123 = vector.broadcast %cst_118 : f32 to vector<4x256xf32>
    %124 = arith.addf %122, %123 : vector<4x256xf32>
    %125 = arith.mulf %124, %120 : vector<4x256xf32>
    %cst_119 = arith.constant 0.0509556942 : f32
    %126 = vector.broadcast %cst_119 : f32 to vector<4x256xf32>
    %127 = arith.addf %125, %126 : vector<4x256xf32>
    %128 = arith.mulf %127, %120 : vector<4x256xf32>
    %cst_120 = arith.constant 0.185208321 : f32
    %129 = vector.broadcast %cst_120 : f32 to vector<4x256xf32>
    %130 = arith.addf %128, %129 : vector<4x256xf32>
    %131 = arith.mulf %130, %120 : vector<4x256xf32>
    %cst_121 = arith.constant 1.12837911 : f32
    %132 = vector.broadcast %cst_121 : f32 to vector<4x256xf32>
    %133 = arith.addf %131, %132 : vector<4x256xf32>
    %cst_122 = arith.constant -1.17916031E-7 : f32
    %134 = vector.broadcast %cst_122 : f32 to vector<4x256xf32>
    %135 = arith.mulf %134, %120 : vector<4x256xf32>
    %cst_123 = arith.constant 2.35479656E-5 : f32
    %136 = vector.broadcast %cst_123 : f32 to vector<4x256xf32>
    %137 = arith.addf %135, %136 : vector<4x256xf32>
    %138 = arith.mulf %137, %120 : vector<4x256xf32>
    %cst_124 = arith.constant 0.00101796258 : f32
    %139 = vector.broadcast %cst_124 : f32 to vector<4x256xf32>
    %140 = arith.addf %138, %139 : vector<4x256xf32>
    %141 = arith.mulf %140, %120 : vector<4x256xf32>
    %cst_125 = arith.constant 0.0140704699 : f32
    %142 = vector.broadcast %cst_125 : f32 to vector<4x256xf32>
    %143 = arith.addf %141, %142 : vector<4x256xf32>
    %144 = arith.mulf %143, %120 : vector<4x256xf32>
    %cst_126 = arith.constant 0.110985048 : f32
    %145 = vector.broadcast %cst_126 : f32 to vector<4x256xf32>
    %146 = arith.addf %144, %145 : vector<4x256xf32>
    %147 = arith.mulf %146, %120 : vector<4x256xf32>
    %cst_127 = arith.constant 0.497469246 : f32
    %148 = vector.broadcast %cst_127 : f32 to vector<4x256xf32>
    %149 = arith.addf %147, %148 : vector<4x256xf32>
    %150 = arith.mulf %149, %120 : vector<4x256xf32>
    %cst_128 = arith.constant 1.000000e+00 : f32
    %151 = vector.broadcast %cst_128 : f32 to vector<4x256xf32>
    %152 = arith.addf %150, %151 : vector<4x256xf32>
    %153 = arith.mulf %119, %133 : vector<4x256xf32>
    %154 = arith.divf %153, %152 : vector<4x256xf32>
    %cst_129 = arith.constant 1.000000e+00 : f32
    %155 = vector.broadcast %cst_129 : f32 to vector<4x256xf32>
    %156 = arith.addf %155, %154 : vector<4x256xf32>
    %157 = arith.mulf %113, %156 : vector<4x256xf32>
    %c0_130 = arith.constant 0 : index
    %c0_131 = arith.constant 0 : index
    %c0_132 = arith.constant 0 : index
    %158 = vector.load %arg6[%c0_130, %c0_131, %c0_132] : memref<1x4x256xf32, #tpu.memory_space<vmem>>, vector<1x4x256xf32>
    %159 = vector.shape_cast %158 : vector<1x4x256xf32> to vector<4x256xf32>
    %160 = vector.shape_cast %157 : vector<4x256xf32> to vector<1x4x256xf32>
    tpu.vector_store %arg6[%c0_130, %c0_131, %c0_132], %160 {strides = array<i32>} : memref<1x4x256xf32, #tpu.memory_space<vmem>>, vector<1x4x256xf32>,
    return
  }
  func.func @transform_0(%arg0: i32) -> (i32, i32, i32) {
    %c0_i32 = arith.constant 0 : i32
    %c0_i32_0 = arith.constant 0 : i32
    %c0_i32_1 = arith.constant 0 : i32
    return %arg0, %c0_i32, %c0_i32_0 : i32, i32, i32
  }
  func.func @transform_1(%arg0: i32) -> (i32, i32, i32) {
    %c0_i32 = arith.constant 0 : i32
    %c0_i32_0 = arith.constant 0 : i32
    %c0_i32_1 = arith.constant 0 : i32
    return %arg0, %c0_i32, %c0_i32_0 : i32, i32, i32
  }
  func.func @transform_2(%arg0: i32) -> (i32, i32, i32) {
    %c0_i32 = arith.constant 0 : i32
    %c0_i32_0 = arith.constant 0 : i32
    %c0_i32_1 = arith.constant 0 : i32
    %c0_i32_2 = arith.constant 0 : i32
    return %c0_i32, %c0_i32_0, %c0_i32_1 : i32, i32, i32
  }
  func.func @transform_3(%arg0: i32) -> (i32, i32, i32) {
    %c0_i32 = arith.constant 0 : i32
    %c0_i32_0 = arith.constant 0 : i32
    %c0_i32_1 = arith.constant 0 : i32
    %c0_i32_2 = arith.constant 0 : i32
    return %c0_i32, %c0_i32_0, %c0_i32_1 : i32, i32, i32
  }
  func.func @transform_4(%arg0: i32) -> (i32, i32) {
    %c0_i32 = arith.constant 0 : i32
    %c0_i32_0 = arith.constant 0 : i32
    %c0_i32_1 = arith.constant 0 : i32
    return %c0_i32, %c0_i32_0 : i32, i32
  }
  func.func @transform_5(%arg0: i32) -> (i32, i32, i32) {
    %c0_i32 = arith.constant 0 : i32
    %c0_i32_0 = arith.constant 0 : i32
    %c0_i32_1 = arith.constant 0 : i32
    return %arg0, %c0_i32, %c0_i32_0 : i32, i32, i32
  }
}

</mosaic_0001>

<bundles_post_ra>
// kernel: _lambda_.2
= control target key start
LH: loop header
LB: loop body
LE: loop exit
PB: predicated region body
PF: predicated region fallthrough
CT: control target
= control target key end

     0   :  { %s1526_s9 = smov 0   ;;  %s2039_s0 = inlined_call_operand.vmem [shape: f32[8,49,4], index: 0, kind: input, shape index: {}]   ;;  %s2040_s1 = inlined_call_operand.vmem [shape: f32[8,4,49], index: 1, kind: input, shape index: {}]   ;;  %s2041_s2 = inlined_call_operand.vmem [shape: bf16[8,49,49], index: 2, kind: output, shape index: {}]  }
   0x1 LB: > { %s1200_s10 = sadd.s32 4294967295, %s1507_s9   ;;  %p1204_p0 = scmp.ge.s32.totalorder %s1507_s9, 1  ;;  %s1507_s9 = sphi %s1526_s9, %s12_s9  }
   0x2   : > { %p125_p1 = scmp.lt.s32.totalorder %s1507_s9, 3 }
   0x4   : > { %p126_p2 = pnand %p1204_p0, %p125_p1 }
   0x5   : > { %s1205_s11 = sshll.u32 (!%p126_p2), %s1200_s10, 2 }
   0x6   : > { %129 = sbr.rel (%p126_p2) target bundleno = 357 (0x165), region = 28  ;;  %p155_p3 = scmp.lt.s32.totalorder (!%p126_p2), %s1205_s11, 7 }
   0xb   : > { %v1509_v0 = vmov 0.0   ;;  %vm1510_vm0 = vmmov 0   ;;  %s2045_s11 = smov (!%p155_p3, %s1205_s11), 7  ;;  %vm228_vm1 = vcmask 1043456   ;;  %vm206_vm2 = vcmask 31744  }
   0xc   : > { %1333 = vmatprep.subr.mxu0 %v1509_v0  ;;  %1356 = vmatprep.subr.mxu1 %v1509_v0  ;;  %s1425_s12 = smul.u32 56, %s2045_s11  ;;  %s1208_s13 = sshll.u32 %s2045_s11, 2  ;;  %vm704_vm3 = vcmask 400384   ;;  %vm716_vm4 = vcmask 393216   ;;  %vm1090_vm5 = vcmask 396288  }
   0xd   : > { %1335 = vmatprep.mubr.msk.f32.mxu0 %vm1510_vm0, %v1509_v0  ;;  %1358 = vmatprep.mubr.msk.f32.mxu1 %vm1510_vm0, %v1509_v0  ;;  %s165_s16 = scalar_lea.vmem %s2040_s1, %s1208_s13  ;;  %s1426_s20 = smul.u32 28, %s2045_s11  ;;  %vm1098_vm6 = vsmask.f32 256 }
   0xe   : > { %s1550_s19 = scalar_lea.vmem %s2039_s0, %s1425_s12  ;;  %v202_v1 = vld [vmem:[%s165_s16] sm:$0xf]  ;;  %v203_v2 = vld [vmem:[%s165_s16 + $0x4] sm:$0xf]  ;;  %v204_v5 = vld [vmem:[%s165_s16 + $0x8] sm:$0xf] }
   0xf   : > { %1334 = vmatpush3.msk.msra.mxu0 %vm228_vm1, %v202_v1  ;;  %1357 = vmatpush3.msk.msra.mxu1 %vm228_vm1, %v203_v2  ;;  %v174_v3 = vld [vmem:[%s1550_s19] sm:$0xff]  ;;  %v181_v4 = vld [vmem:[%s1550_s19 + $0x38] sm:$0xff]  ;;  %v175_v6 = vld [vmem:[%s1550_s19 + $0x8] sm:$0xff]  ;;  %s1918_s23 = scalar_lea.vmem %s2041_s2, %s1426_s20 }
  0x10   : > { %1336 = vmatmul.mubr.msk.f32.vlgmr.msra.gmra.mxu0 %vm206_vm2, %v174_v3  ;;  %1359 = vmatmul.mubr.msk.f32.vlgmr.msra.gmra.mxu1 %vm206_vm2, %v181_v4  ;;  %v182_v7 = vld [vmem:[%s1550_s19 + $0x40] sm:$0xff]  ;;  %v205_v8 = vld [vmem:[%s165_s16 + $0xc] sm:$0xf]  ;;  %v176_v9 = vld [vmem:[%s1550_s19 + $0x10] sm:$0xff] }
  0x11   : > { %1379 = vmatprep.subr.mxu0 %v1509_v0  ;;  %1338 = vmatprep.mubr.msk.f32.mxu0 %vm1510_vm0, %v1509_v0  ;;  %v183_v10 = vld [vmem:[%s1550_s19 + $0x48] sm:$0xff]  ;;  %v177_v11 = vld [vmem:[%s1550_s19 + $0x18] sm:$0xff]  ;;  %v184_v12 = vld [vmem:[%s1550_s19 + $0x50] sm:$0xff] }
  0x12   : > { %1380 = vmatpush3.msk.msra.mxu0 %vm228_vm1, %v204_v5  ;;  %1361 = vmatprep.mubr.msk.f32.mxu1 %vm1510_vm0, %v1509_v0  ;;  %v178_v13 = vld [vmem:[%s1550_s19 + $0x20] sm:$0xff]  ;;  %v185_v14 = vld [vmem:[%s1550_s19 + $0x58] sm:$0xff]  ;;  %v179_v15 = vld [vmem:[%s1550_s19 + $0x28] sm:$0xff] }
  0x13   : > { %1402 = vmatprep.subr.mxu1 %v1509_v0  ;;  %v186_v16 = vld [vmem:[%s1550_s19 + $0x60] sm:$0xff]  ;;  %v180_v17 = vld [vmem:[%s1550_s19 + $0x30] sm:$0x1]  ;;  %v187_v18 = vld [vmem:[%s1550_s19 + $0x68] sm:$0x1] }
  0x14   : > { %1339 = vmatmul.mubr.msk.f32.gmra.mxu0 %vm206_vm2, %v175_v6  ;;  %1362 = vmatmul.mubr.msk.f32.gmra.mxu1 %vm206_vm2, %v182_v7  ;;  %v188_v19 = vld [vmem:[%s1550_s19 + $0x70] sm:$0xff]  ;;  %v195_v20 = vld [vmem:[%s1550_s19 + $0xa8] sm:$0xff]  ;;  %v189_v21 = vld [vmem:[%s1550_s19 + $0x78] sm:$0xff] }
  0x15   : > { %1341 = vmatprep.mubr.msk.f32.mxu0 %vm1510_vm0, %v1509_v0  ;;  %1364 = vmatprep.mubr.msk.f32.mxu1 %vm1510_vm0, %v1509_v0  ;;  %v196_v22 = vld [vmem:[%s1550_s19 + $0xb0] sm:$0xff]  ;;  %v190_v23 = vld [vmem:[%s1550_s19 + $0x80] sm:$0xff]  ;;  %v197_v24 = vld [vmem:[%s1550_s19 + $0xb8] sm:$0xff] }
  0x16   : > { %1403 = vmatpush3.msk.msra.mxu1 %vm228_vm1, %v205_v8  ;;  %v191_v25 = vld [vmem:[%s1550_s19 + $0x88] sm:$0xff]  ;;  %v198_v26 = vld [vmem:[%s1550_s19 + $0xc0] sm:$0xff]  ;;  %v192_v27 = vld [vmem:[%s1550_s19 + $0x90] sm:$0xff] }
  0x17   : > { %v199_v28 = vld [vmem:[%s1550_s19 + $0xc8] sm:$0xff]  ;;  %v193_v29 = vld [vmem:[%s1550_s19 + $0x98] sm:$0xff]  ;;  %v200_v30 = vld [vmem:[%s1550_s19 + $0xd0] sm:$0xff] }
  0x18   : > { %1342 = vmatmul.mubr.msk.f32.gmra.mxu0 %vm206_vm2, %v176_v9  ;;  %1365 = vmatmul.mubr.msk.f32.gmra.mxu1 %vm206_vm2, %v183_v10  ;;  %v194_v31 = vld [vmem:[%s1550_s19 + $0xa0] sm:$0x1]  ;;  %v201_v32 = vld [vmem:[%s1550_s19 + $0xd8] sm:$0x1]  ;;  %vm1937_vm7 = vmand %vm716_vm4, %vm1098_vm6 }
  0x19   : > { %1344 = vmatprep.mubr.msk.f32.mxu0 %vm1510_vm0, %v1509_v0  ;;  %1367 = vmatprep.mubr.msk.f32.mxu1 %vm1510_vm0, %v1509_v0 }
  0x1c   : > { %1345 = vmatmul.mubr.msk.f32.gmra.mxu0 %vm206_vm2, %v177_v11  ;;  %1368 = vmatmul.mubr.msk.f32.gmra.mxu1 %vm206_vm2, %v184_v12 }
  0x1d   : > { %1347 = vmatprep.mubr.msk.f32.mxu0 %vm1510_vm0, %v1509_v0  ;;  %1370 = vmatprep.mubr.msk.f32.mxu1 %vm1510_vm0, %v1509_v0 }
  0x20   : > { %1348 = vmatmul.mubr.msk.f32.gmra.mxu0 %vm206_vm2, %v178_v13  ;;  %1371 = vmatmul.mubr.msk.f32.gmra.mxu1 %vm206_vm2, %v185_v14 }
  0x21   : > { %1350 = vmatprep.mubr.msk.f32.mxu0 %vm1510_vm0, %v1509_v0  ;;  %1373 = vmatprep.mubr.msk.f32.mxu1 %vm1510_vm0, %v1509_v0 }
  0x24   : > { %1351 = vmatmul.mubr.msk.f32.gmra.mxu0 %vm206_vm2, %v179_v15  ;;  %1374 = vmatmul.mubr.msk.f32.gmra.mxu1 %vm206_vm2, %v186_v16 }
  0x25   : > { %1353 = vmatprep.mubr.msk.f32.mxu0 %vm1510_vm0, %v1509_v0  ;;  %1376 = vmatprep.mubr.msk.f32.mxu1 %vm1510_vm0, %v1509_v0 }
  0x28   : > { %1354 = vmatmul.mubr.msk.f32.gmra.mxu0 %vm206_vm2, %v180_v17  ;;  %1377 = vmatmul.mubr.msk.f32.gmra.mxu1 %vm206_vm2, %v187_v18 }
  0x29   : > { %1381 = vmatprep.mubr.msk.f32.mxu0 %vm1510_vm0, %v1509_v0  ;;  %1404 = vmatprep.mubr.msk.f32.mxu1 %vm1510_vm0, %v1509_v0 }
  0x2c   : > { %1382 = vmatmul.mubr.msk.f32.vlgmr.msra.gmra.mxu0 %vm206_vm2, %v188_v19  ;;  %1405 = vmatmul.mubr.msk.f32.vlgmr.msra.gmra.mxu1 %vm206_vm2, %v195_v20 }
  0x2d   : > { %1384 = vmatprep.mubr.msk.f32.mxu0 %vm1510_vm0, %v1509_v0  ;;  %1407 = vmatprep.mubr.msk.f32.mxu1 %vm1510_vm0, %v1509_v0 }
  0x30   : > { %1385 = vmatmul.mubr.msk.f32.gmra.mxu0 %vm206_vm2, %v189_v21  ;;  %1408 = vmatmul.mubr.msk.f32.gmra.mxu1 %vm206_vm2, %v196_v22 }
  0x31   : > { %1387 = vmatprep.mubr.msk.f32.mxu0 %vm1510_vm0, %v1509_v0  ;;  %1410 = vmatprep.mubr.msk.f32.mxu1 %vm1510_vm0, %v1509_v0 }
  0x34   : > { %1388 = vmatmul.mubr.msk.f32.gmra.mxu0 %vm206_vm2, %v190_v23  ;;  %1411 = vmatmul.mubr.msk.f32.gmra.mxu1 %vm206_vm2, %v197_v24 }
  0x35   : > { %1390 = vmatprep.mubr.msk.f32.mxu0 %vm1510_vm0, %v1509_v0  ;;  %1413 = vmatprep.mubr.msk.f32.mxu1 %vm1510_vm0, %v1509_v0 }
  0x38   : > { %1391 = vmatmul.mubr.msk.f32.gmra.mxu0 %vm206_vm2, %v191_v25  ;;  %1414 = vmatmul.mubr.msk.f32.gmra.mxu1 %vm206_vm2, %v198_v26 }
  0x39   : > { %1393 = vmatprep.mubr.msk.f32.mxu0 %vm1510_vm0, %v1509_v0  ;;  %1416 = vmatprep.mubr.msk.f32.mxu1 %vm1510_vm0, %v1509_v0 }
  0x3c   : > { %1394 = vmatmul.mubr.msk.f32.gmra.mxu0 %vm206_vm2, %v192_v27  ;;  %1417 = vmatmul.mubr.msk.f32.gmra.mxu1 %vm206_vm2, %v199_v28 }
  0x3d   : > { %1396 = vmatprep.mubr.msk.f32.mxu0 %vm1510_vm0, %v1509_v0  ;;  %1419 = vmatprep.mubr.msk.f32.mxu1 %vm1510_vm0, %v1509_v0 }
  0x40   : > { %1397 = vmatmul.mubr.msk.f32.gmra.mxu0 %vm206_vm2, %v193_v29  ;;  %1420 = vmatmul.mubr.msk.f32.gmra.mxu1 %vm206_vm2, %v200_v30 }
  0x41   : > { %1399 = vmatprep.mubr.msk.f32.mxu0 %vm1510_vm0, %v1509_v0  ;;  %1422 = vmatprep.mubr.msk.f32.mxu1 %vm1510_vm0, %v1509_v0 }
  0x44   : > { %1400 = vmatmul.mubr.msk.f32.gmra.mxu0 %vm206_vm2, %v194_v31  ;;  %1423 = vmatmul.mubr.msk.f32.gmra.mxu1 %vm206_vm2, %v201_v32 }
  0xd0   : > { %v1666_v33 = vpop.f32.mrf.mxu0  ;;  %v1668_v34 = vpop.f32.mrf.mxu1 }
  0xd1   : > { %v725_v41 = vsel %vm704_vm3, %v1668_v34, -inf  ;;  %v705_v55 = vsel %vm704_vm3, %v1666_v33, -inf }
  0xd2   : > { %v1337_v35 = vpop.f32.mrf.mxu0  ;;  %v1360_v36 = vpop.f32.mrf.mxu1 }
  0xd4   : > { %v1670_v37 = vpop.f32.mrf.mxu0  ;;  %v1672_v38 = vpop.f32.mrf.mxu1 }
  0xd5   : > { %v726_v42 = vsel %vm704_vm3, %v1672_v38, -inf  ;;  %v706_v51 = vsel %vm704_vm3, %v1670_v37, -inf }
  0xd6   : > { %v1340_v39 = vpop.f32.mrf.mxu0  ;;  %v1363_v40 = vpop.f32.mrf.mxu1  ;;  %v727_v45 = vmax.f32 %v725_v41, %v726_v42  ;;  %v707_v58 = vmax.f32 %v705_v55, %v706_v51 }
  0xd8   : > { %v1678_v43 = vpop.f32.mrf.mxu0  ;;  %v1680_v44 = vpop.f32.mrf.mxu1 }
  0xd9   : > { %v728_v48 = vsel %vm704_vm3, %v1680_v44, -inf  ;;  %v708_v56 = vsel %vm704_vm3, %v1678_v43, -inf }
  0xda   : > { %v1343_v46 = vpop.f32.mrf.mxu0  ;;  %v1366_v47 = vpop.f32.mrf.mxu1  ;;  %v729_v52 = vmax.f32 %v727_v45, %v728_v48  ;;  %v709_v62 = vmax.f32 %v707_v58, %v708_v56 }
  0xdc   : > { %v1684_v49 = vpop.f32.mrf.mxu0  ;;  %v1686_v50 = vpop.f32.mrf.mxu1 }
  0xdd   : > { %v730_v57 = vsel %vm704_vm3, %v1686_v50, -inf  ;;  %v710_v61 = vsel %vm704_vm3, %v1684_v49, -inf }
  0xde   : > { %v1346_v53 = vpop.f32.mrf.mxu0  ;;  %v1369_v54 = vpop.f32.mrf.mxu1  ;;  %v731_v63 = vmax.f32 %v729_v52, %v730_v57  ;;  %v711_v4 = vmax.f32 %v709_v62, %v710_v61 }
  0xe0   : > { %v1696_v59 = vpop.f32.mrf.mxu0  ;;  %v1698_v60 = vpop.f32.mrf.mxu1 }
  0xe1   : > { %v712_v2 = vsel %vm704_vm3, %v1696_v59, -inf  ;;  %v732_v3 = vsel %vm704_vm3, %v1698_v60, -inf }
  0xe2   : > { %v1349_v0 = vpop.f32.mrf.mxu0  ;;  %v1372_v1 = vpop.f32.mrf.mxu1  ;;  %v713_v9 = vmax.f32 %v711_v4, %v712_v2  ;;  %v733_v10 = vmax.f32 %v731_v63, %v732_v3 }
  0xe4   : > { %v1706_v5 = vpop.f32.mrf.mxu0  ;;  %v1708_v6 = vpop.f32.mrf.mxu1 }
  0xe5   : > { %v714_v7 = vsel %vm704_vm3, %v1706_v5, -inf  ;;  %v734_v8 = vsel %vm704_vm3, %v1708_v6, -inf }
  0xe6   : > { %v1352_v11 = vpop.f32.mrf.mxu0  ;;  %v1375_v12 = vpop.f32.mrf.mxu1  ;;  %v715_v13 = vmax.f32 %v713_v9, %v714_v7  ;;  %v735_v14 = vmax.f32 %v733_v10, %v734_v8 }
  0xe8   : > { %v1714_v15 = vpop.f32.mrf.mxu0  ;;  %v1716_v16 = vpop.f32.mrf.mxu1 }
  0xe9   : > { %v717_v17 = vsel %vm716_vm4, %v1714_v15, -inf  ;;  %v736_v18 = vsel %vm716_vm4, %v1716_v16, -inf }
  0xea   : > { %v718_v19 = vmax.f32 %v715_v13, %v717_v17  ;;  %v737_v20 = vmax.f32 %v735_v14, %v736_v18  ;;  %v1355_v21 = vpop.f32.mrf.mxu0  ;;  %v1378_v22 = vpop.f32.mrf.mxu1 }
  0xec   : > { %v719_v23 = vrot.slane %v718_v19, 4  ;;  %v738_v24 = vrot.slane %v737_v20, 4  ;;  %v1722_v25 = vpop.f32.mrf.mxu0  ;;  %v1724_v26 = vpop.f32.mrf.mxu1 }
  0xed   : > { %v763_v47 = vsel %vm704_vm3, %v1724_v26, -inf  ;;  %v744_v54 = vsel %vm704_vm3, %v1722_v25, -inf }
  0xee   : > { %v720_v27 = vmax.f32 %v718_v19, %v719_v23  ;;  %v739_v28 = vmax.f32 %v737_v20, %v738_v24  ;;  %v1383_v29 = vpop.f32.mrf.mxu0  ;;  %v1406_v30 = vpop.f32.mrf.mxu1 }
  0xf0   : > { %v721_v31 = vrot.slane %v720_v27, 2  ;;  %v740_v32 = vrot.slane %v739_v28, 2  ;;  %v1726_v35 = vpop.f32.mrf.mxu0  ;;  %v1728_v36 = vpop.f32.mrf.mxu1 }
  0xf1   : > { %v764_v48 = vsel %vm704_vm3, %v1728_v36, -inf  ;;  %v745_v58 = vsel %vm704_vm3, %v1726_v35, -inf }
  0xf2   : > { %v722_v39 = vmax.f32 %v720_v27, %v721_v31  ;;  %v741_v40 = vmax.f32 %v739_v28, %v740_v32  ;;  %v1386_v41 = vpop.f32.mrf.mxu0  ;;  %v1409_v42 = vpop.f32.mrf.mxu1  ;;  %v765_v61 = vmax.f32 %v763_v47, %v764_v48  ;;  %v746_v12 = vmax.f32 %v744_v54, %v745_v58 }
  0xf4   : > { %v723_v45 = vrot.slane %v722_v39, 1  ;;  %v742_v46 = vrot.slane %v741_v40, 1  ;;  %v1734_v51 = vpop.f32.mrf.mxu0  ;;  %v1736_v52 = vpop.f32.mrf.mxu1 }
  0xf5   : > { %v747_v62 = vsel %vm704_vm3, %v1734_v51, -inf  ;;  %v766_v10 = vsel %vm704_vm3, %v1736_v52, -inf }
  0xf6   : > { %v724_v53 = vmax.f32 %v722_v39, %v723_v45  ;;  %v1389_v55 = vpop.f32.mrf.mxu0  ;;  %v1412_v56 = vpop.f32.mrf.mxu1  ;;  %v1740_v57 = vmax.f32 %v741_v40, %v742_v46  ;;  %v748_v17 = vmax.f32 %v746_v12, %v747_v62  ;;  %v767_v18 = vmax.f32 %v765_v61, %v766_v10 }
  0xf8   : > { %v782_v63 = vsub.f32 %v1666_v33, %v724_v53  ;;  %v783_v0 = vsub.f32 %v1670_v37, %v724_v53  ;;  %v784_v1 = vsub.f32 %v1678_v43, %v724_v53  ;;  %v785_v2 = vsub.f32 %v1684_v49, %v724_v53  ;;  %v1750_v3 = vpop.f32.mrf.mxu0  ;;  %v1752_v4 = vpop.f32.mrf.mxu1 }
  0xf9   : > { %v786_v7 = vsub.f32 %v1696_v59, %v724_v53  ;;  %v787_v8 = vsub.f32 %v1706_v5, %v724_v53  ;;  %v788_v9 = vsub.f32 %v1714_v15, %v724_v53  ;;  %v789_v14 = vsub.f32 %v1668_v34, %v1740_v57 }
  0xfa   : > { %v810_v33 = vmul.f32 1.442695, %v782_v63  ;;  %v812_v11 = vmul.f32 1.442695, %v783_v0  ;;  %v814_v37 = vmul.f32 1.442695, %v784_v1  ;;  %v1392_v43 = vpop.f32.mrf.mxu0  ;;  %v1415_v13 = vpop.f32.mrf.mxu1  ;;  %v790_v59 = vsub.f32 %v1672_v38, %v1740_v57 }
  0xfb   : > { %v816_v49 = vmul.f32 1.442695, %v785_v2  ;;  %v791_v5 = vsub.f32 %v1680_v44, %v1740_v57  ;;  %v818_v15 = vmul.f32 1.442695, %v786_v7  ;;  %v820_v21 = vmul.f32 1.442695, %v787_v8 }
  0xfc   : > { %1437 = vpow2.f32 %v810_v33  ;;  %v1765_v19 = vpop.f32.mrf.mxu0  ;;  %v1767_v20 = vpop.f32.mrf.mxu1  ;;  %v822_v22 = vmul.f32 1.442695, %v788_v9  ;;  %v792_v34 = vsub.f32 %v1686_v50, %v1740_v57  ;;  %v793_v38 = vsub.f32 %v1698_v60, %v1740_v57 }
  0xfd   : > { %1439 = vpow2.f32 %v812_v11  ;;  %v794_v44 = vsub.f32 %v1708_v6, %v1740_v57  ;;  %v795_v23 = vsub.f32 %v1716_v16, %v1740_v57  ;;  %v824_v28 = vmul.f32 1.442695, %v789_v14 }
  0xfe   : > { %1441 = vpow2.f32 %v814_v37  ;;  %v1395_v24 = vpop.f32.mrf.mxu0  ;;  %v1418_v27 = vpop.f32.mrf.mxu1  ;;  %v826_v29 = vmul.f32 1.442695, %v790_v59  ;;  %v828_v30 = vmul.f32 1.442695, %v791_v5  ;;  %v749_v50 = vsel %vm704_vm3, %v1750_v3, -inf }
  0xff   : > { %1443 = vpow2.f32 %v816_v49  ;;  %v768_v31 = vsel %vm704_vm3, %v1752_v4, -inf  ;;  %v751_v60 = vsel %vm704_vm3, %v1765_v19, -inf  ;;  %v750_v16 = vmax.f32 %v748_v17, %v749_v50 }
 0x100   : > { %1445 = vpow2.f32 %v818_v15  ;;  %v1783_v6 = vpop.f32.mrf.mxu0  ;;  %v1785_v32 = vpop.f32.mrf.mxu1  ;;  %v769_v39 = vmax.f32 %v767_v18, %v768_v31  ;;  %v770_v40 = vsel %vm704_vm3, %v1767_v20, -inf  ;;  %v830_v41 = vmul.f32 1.442695, %v792_v34 }
 0x101   : > { %1447 = vpow2.f32 %v820_v21  ;;  %v753_v42 = vsel %vm704_vm3, %v1783_v6, -inf  ;;  %v772_v45 = vsel %vm704_vm3, %v1785_v32, -inf  ;;  %v832_v48 = vmul.f32 1.442695, %v793_v38 }
 0x102   : > { %1449 = vpow2.f32 %v822_v22  ;;  %v1398_v46 = vpop.f32.mrf.mxu0  ;;  %v1421_v47 = vpop.f32.mrf.mxu1  ;;  %v752_v53 = vmax.f32 %v750_v16, %v751_v60  ;;  %v771_v54 = vmax.f32 %v769_v39, %v770_v40  ;;  %v834_v55 = vmul.f32 1.442695, %v794_v44 }
 0x103   : > { %1451 = vpow2.f32 %v824_v28  ;;  %v836_v56 = vmul.f32 1.442695, %v795_v23 }
 0x104   : > { %1453 = vpow2.f32 %v826_v29  ;;  %v1793_v57 = vpop.f32.mrf.mxu0  ;;  %v1795_v58 = vpop.f32.mrf.mxu1  ;;  %v754_v61 = vmax.f32 %v752_v53, %v753_v42  ;;  %v773_v62 = vmax.f32 %v771_v54, %v772_v45 }
 0x105   : > { %1455 = vpow2.f32 %v828_v30  ;;  %v755_v63 = vsel %vm716_vm4, %v1793_v57, -inf  ;;  %v774_v0 = vsel %vm716_vm4, %v1795_v58, -inf }
 0x106   : > { %1457 = vpow2.f32 %v830_v41  ;;  %v1401_v1 = vpop.f32.mrf.mxu0  ;;  %v1424_v2 = vpop.f32.mrf.mxu1  ;;  %v756_v7 = vmax.f32 %v754_v61, %v755_v63  ;;  %v775_v8 = vmax.f32 %v773_v62, %v774_v0 }
 0x107   : > { %1459 = vpow2.f32 %v832_v48 }
 0x108   : > { %1461 = vpow2.f32 %v834_v55  ;;  %v757_v10 = vrot.slane %v756_v7, 4  ;;  %v776_v33 = vrot.slane %v775_v8, 4 }
 0x109   : > { %v1801_v9 = vpop.eup %1437  ;;  %1463 = vpow2.f32 %v836_v56 }
 0x10a   : > { %v1803_v11 = vpop.eup %1439  ;;  %v866_v37 = vsel %vm704_vm3, %v1801_v9, 0.0  ;;  %v758_v13 = vmax.f32 %v756_v7, %v757_v10  ;;  %v777_v49 = vmax.f32 %v775_v8, %v776_v33 }
 0x10b   : > { %v1807_v12 = vpop.eup %1441  ;;  %v867_v43 = vsel %vm704_vm3, %v1803_v11, 0.0 }
 0x10c   : > { %v1811_v14 = vpop.eup %1443  ;;  %v868_v59 = vadd.f32 %v867_v43, %v866_v37  ;;  %v869_v15 = vsel %vm704_vm3, %v1807_v12, 0.0  ;;  %v759_v17 = vrot.slane %v758_v13, 2  ;;  %v778_v18 = vrot.slane %v777_v49, 2 }
 0x10d   : > { %v1813_v5 = vpop.eup %1445  ;;  %v871_v38 = vsel %vm704_vm3, %v1811_v14, 0.0 }
 0x10e   : > { %v1817_v21 = vpop.eup %1447  ;;  %v870_v22 = vadd.f32 %v869_v15, %v868_v59  ;;  %v760_v44 = vmax.f32 %v758_v13, %v759_v17  ;;  %v779_v23 = vmax.f32 %v777_v49, %v778_v18  ;;  %v873_v29 = vsel %vm704_vm3, %v1813_v5, 0.0 }
 0x10f   : > { %v1819_v34 = vpop.eup %1449  ;;  %v875_v41 = vsel %vm704_vm3, %v1817_v21, 0.0 }
 0x110   : > { %v1823_v24 = vpop.eup %1451  ;;  %v872_v27 = vadd.f32 %v871_v38, %v870_v22  ;;  %v761_v50 = vrot.slane %v760_v44, 1  ;;  %v780_v31 = vrot.slane %v779_v23, 1  ;;  %v877_v48 = vsel %vm716_vm4, %v1819_v34, 0.0 }
 0x111   : > { %v1825_v28 = vpop.eup %1453  ;;  %v885_v30 = vsel %vm704_vm3, %v1823_v24, 0.0 }
 0x112   : > { %v1831_v60 = vpop.eup %1455  ;;  %v874_v16 = vadd.f32 %v873_v29, %v872_v27  ;;  %v886_v39 = vsel %vm704_vm3, %v1825_v28, 0.0  ;;  %v762_v45 = vmax.f32 %v760_v44, %v761_v50  ;;  %v1845_v54 = vmax.f32 %v779_v23, %v780_v31 }
 0x113   : > { %v1835_v40 = vpop.eup %1457  ;;  %v887_v42 = vadd.f32 %v886_v39, %v885_v30  ;;  %v888_v53 = vsel %vm704_vm3, %v1831_v60, 0.0 }
 0x114   : > { %v1839_v46 = vpop.eup %1459  ;;  %v876_v47 = vadd.f32 %v875_v41, %v874_v16  ;;  %v890_v61 = vsel %vm704_vm3, %v1835_v40, 0.0  ;;  %v796_v62 = vsub.f32 %v1722_v25, %v762_v45  ;;  %v797_v63 = vsub.f32 %v1726_v35, %v762_v45 }
 0x115   : > { %v1847_v55 = vpop.eup %1461  ;;  %v889_v56 = vadd.f32 %v888_v53, %v887_v42  ;;  %v892_v2 = vsel %vm704_vm3, %v1839_v46, 0.0  ;;  %v798_v7 = vsub.f32 %v1734_v51, %v762_v45  ;;  %v799_v8 = vsub.f32 %v1750_v3, %v762_v45 }
 0x116   : > { %v1853_v0 = vpop.eup %1463  ;;  %v878_v1 = vadd.f32 %v877_v48, %v876_v47  ;;  %v894_v33 = vsel %vm704_vm3, %v1847_v55, 0.0  ;;  %v800_v37 = vsub.f32 %v1765_v19, %v762_v45  ;;  %v801_v25 = vsub.f32 %v1783_v6, %v762_v45 }
 0x117   : > { %v891_v10 = vadd.f32 %v890_v61, %v889_v56  ;;  %v802_v35 = vsub.f32 %v1793_v57, %v762_v45  ;;  %v838_v13 = vmul.f32 1.442695, %v796_v62  ;;  %v840_v49 = vmul.f32 1.442695, %v797_v63 }
 0x118   : > { %v879_v43 = vrot.slane %v878_v1, 4  ;;  %v896_v15 = vsel %vm716_vm4, %v1853_v0, 0.0  ;;  %v842_v51 = vmul.f32 1.442695, %v798_v7  ;;  %v844_v17 = vmul.f32 1.442695, %v799_v8 }
 0x119   : > { %v893_v59 = vadd.f32 %v892_v2, %v891_v10  ;;  %1465 = vpow2.f32 %v838_v13  ;;  %v846_v18 = vmul.f32 1.442695, %v800_v37  ;;  %v848_v22 = vmul.f32 1.442695, %v801_v25 }
 0x11a   : > { %v880_v3 = vadd.f32 %v879_v43, %v878_v1  ;;  %1467 = vpow2.f32 %v840_v49  ;;  %v803_v19 = vsub.f32 %v1724_v26, %v1845_v54  ;;  %v804_v6 = vsub.f32 %v1728_v36, %v1845_v54 }
 0x11b   : > { %v895_v38 = vadd.f32 %v894_v33, %v893_v59  ;;  %1469 = vpow2.f32 %v842_v51  ;;  %v850_v44 = vmul.f32 1.442695, %v802_v35  ;;  %v805_v23 = vsub.f32 %v1736_v52, %v1845_v54 }
 0x11c   : > { %v881_v57 = vrot.slane %v880_v3, 2  ;;  %1471 = vpow2.f32 %v844_v17  ;;  %v806_v30 = vsub.f32 %v1752_v4, %v1845_v54  ;;  %v852_v50 = vmul.f32 1.442695, %v803_v19 }
 0x11d   : > { %v897_v27 = vadd.f32 %v896_v15, %v895_v38  ;;  %1473 = vpow2.f32 %v846_v18  ;;  %v854_v26 = vmul.f32 1.442695, %v804_v6  ;;  %v856_v16 = vmul.f32 1.442695, %v805_v23 }
 0x11e   : > { %v882_v29 = vadd.f32 %v881_v57, %v880_v3  ;;  %1475 = vpow2.f32 %v848_v22  ;;  %v858_v52 = vmul.f32 1.442695, %v806_v30  ;;  %v807_v45 = vsub.f32 %v1767_v20, %v1845_v54 }
 0x11f   : > { %v898_v31 = vrot.slane %v897_v27, 4  ;;  %1477 = vpow2.f32 %v850_v44  ;;  %v808_v4 = vsub.f32 %v1785_v32, %v1845_v54  ;;  %v809_v62 = vsub.f32 %v1795_v58, %v1845_v54 }
 0x120   : > { %v883_v39 = vrot.slane %v882_v29, 1  ;;  %1479 = vpow2.f32 %v852_v50  ;;  %v860_v63 = vmul.f32 1.442695, %v807_v45 }
 0x121   : > { %v899_v36 = vadd.f32 %v898_v31, %v897_v27  ;;  %1481 = vpow2.f32 %v854_v26  ;;  %v862_v8 = vmul.f32 1.442695, %v808_v4  ;;  %v864_v54 = vmul.f32 1.442695, %v809_v62 }
 0x122   : > { %v884_v41 = vadd.f32 %v883_v39, %v882_v29  ;;  %1483 = vpow2.f32 %v856_v16 }
 0x123   : > { %v900_v42 = vrot.slane %v899_v36, 2 }
 0x124   : > { %1485 = vrcp.f32 %v884_v41 }
 0x125   : > { %v901_v47 = vadd.f32 %v900_v42, %v899_v36  ;;  %1487 = vpow2.f32 %v858_v52 }
 0x126   : > { %v1878_v48 = vpop.eup %1465 }
 0x127   : > { %v902_v53 = vrot.slane %v901_v47, 1  ;;  %v1880_v56 = vpop.eup %1467  ;;  %v904_v61 = vsel %vm704_vm3, %v1878_v48, 0.0 }
 0x128   : > { %v1886_v1 = vpop.eup %1469  ;;  %v905_v32 = vsel %vm704_vm3, %v1880_v56, 0.0 }
 0x129   : > { %v903_v20 = vadd.f32 %v902_v53, %v901_v47  ;;  %v1890_v2 = vpop.eup %1471  ;;  %v906_v7 = vadd.f32 %v905_v32, %v904_v61  ;;  %v907_v33 = vsel %vm704_vm3, %v1886_v1, 0.0 }
 0x12a   : > { %v1892_v10 = vpop.eup %1473  ;;  %v909_v43 = vsel %vm704_vm3, %v1890_v2, 0.0 }
 0x12b   : > { %1489 = vrcp.f32 %v903_v20  ;;  %v1896_v37 = vpop.eup %1475  ;;  %v908_v58 = vadd.f32 %v907_v33, %v906_v7  ;;  %v911_v59 = vsel %vm704_vm3, %v1892_v10, 0.0 }
 0x12c   : > { %1491 = vpow2.f32 %v860_v63  ;;  %v1898_v25 = vpop.eup %1477  ;;  %v913_v22 = vsel %vm704_vm3, %v1896_v37, 0.0 }
 0x12d   : > { %v1903_v35 = vpop.eup %1479  ;;  %v910_v13 = vadd.f32 %v909_v43, %v908_v58  ;;  %1493 = vpow2.f32 %v862_v8  ;;  %v915_v38 = vsel %vm716_vm4, %v1898_v25, 0.0 }
 0x12e   : > { %v1905_v49 = vpop.eup %1481  ;;  %v923_v15 = vsel %vm704_vm3, %v1903_v35, 0.0  ;;  %1495 = vpow2.f32 %v864_v54 }
 0x12f   : > { %v1911_v51 = vpop.eup %1483  ;;  %v912_v17 = vadd.f32 %v911_v59, %v910_v13  ;;  %v924_v3 = vsel %vm704_vm3, %v1905_v49, 0.0 }
 0x130   : > { %v925_v19 = vadd.f32 %v924_v3, %v923_v15  ;;  %v926_v6 = vsel %vm704_vm3, %v1911_v51, 0.0  ;;  %v1109_v3 = vld [vmem:[%s1918_s23 + $0x34] sm:$0x1] }
 0x131   : > { %v1486_v18 = vpop.eup %1485  ;;  %v914_v31 = vadd.f32 %v913_v22, %v912_v17 }
 0x132   : > { %v946_v57 = vmul.f32 %v1486_v18, %v1801_v9  ;;  %v947_v44 = vmul.f32 %v1486_v18, %v1803_v11  ;;  %v948_v23 = vmul.f32 %v1486_v18, %v1807_v12  ;;  %v949_v27 = vmul.f32 %v1486_v18, %v1811_v14  ;;  %v1933_v26 = vpop.eup %1487 }
 0x133   : > { %v950_v29 = vmul.f32 %v1486_v18, %v1813_v5  ;;  %v951_v30 = vmul.f32 %v1486_v18, %v1817_v21  ;;  %v952_v50 = vmul.f32 %v1486_v18, %v1819_v34  ;;  %v1100_v5 = vld [vmem:[%s1918_s23 + $0x18] sm:$0x1]  ;;  %v916_v36 = vadd.f32 %v915_v38, %v914_v31 }
 0x134   : > { %v1273_v9 = vpack.c.bf16 %v946_v57, %v946_v57  ;;  %v1274_v11 = vpack.c.bf16 %v947_v44, %v947_v44  ;;  %v1275_v12 = vpack.c.bf16 %v948_v23, %v948_v23  ;;  %v1276_v16 = vpack.c.bf16 %v949_v27, %v949_v27 }
 0x135   : > { %v1277_v21 = vpack.c.bf16 %v950_v29, %v950_v29  ;;  %v1278_v34 = vpack.c.bf16 %v951_v30, %v951_v30  ;;  %v1279_v39 = vpack.c.bf16 %v952_v50, %v952_v50  ;;  %v927_v41 = vadd.f32 %v926_v6, %v925_v19 }
 0x136   : > { %1091 = vst.msk [vmem:[%s1918_s23] sm:$0xf] %vm1090_vm5, %v1273_v9  ;;  %1092 = vst.msk [vmem:[%s1918_s23 + $0x4] sm:$0xf] %vm1090_vm5, %v1274_v11  ;;  %v917_v52 = vrot.slane %v916_v36, 4  ;;  %v928_v45 = vsel %vm704_vm3, %v1933_v26, 0.0 }
 0x137   : > { %1093 = vst.msk [vmem:[%s1918_s23 + $0x8] sm:$0xf] %vm1090_vm5, %v1275_v12  ;;  %1094 = vst.msk [vmem:[%s1918_s23 + $0xc] sm:$0xf] %vm1090_vm5, %v1276_v16  ;;  %v1101_v42 = vsel %vm1937_vm7, %v1279_v39, %v1100_v5  ;;  %v929_v4 = vadd.f32 %v928_v45, %v927_v41 }
 0x138   : > { %1095 = vst.msk [vmem:[%s1918_s23 + $0x10] sm:$0xf] %vm1090_vm5, %v1277_v21  ;;  %1096 = vst.msk [vmem:[%s1918_s23 + $0x14] sm:$0xf] %vm1090_vm5, %v1278_v34  ;;  %v1490_v47 = vpop.eup %1489  ;;  %v918_v33 = vadd.f32 %v917_v52, %v916_v36 }
 0x139   : > { %1102 = vst [vmem:[%s1918_s23 + $0x18] sm:$0x1] %v1101_v42  ;;  %v1959_v53 = vpop.eup %1491  ;;  %v953_v61 = vmul.f32 %v1490_v47, %v1823_v24  ;;  %v954_v62 = vmul.f32 %v1490_v47, %v1825_v28  ;;  %v955_v63 = vmul.f32 %v1490_v47, %v1831_v60  ;;  %v956_v20 = vmul.f32 %v1490_v47, %v1835_v40 }
 0x13a   : > { %v957_v32 = vmul.f32 %v1490_v47, %v1839_v46  ;;  %v958_v7 = vmul.f32 %v1490_v47, %v1847_v55  ;;  %v959_v8 = vmul.f32 %v1490_v47, %v1853_v0  ;;  %v1968_v58 = vpop.eup %1493  ;;  %v919_v13 = vrot.slane %v918_v33, 2 }
 0x13b   : > { %v1280_v24 = vpack.c.bf16 %v953_v61, %v953_v61  ;;  %v1281_v28 = vpack.c.bf16 %v954_v62, %v954_v62  ;;  %v1282_v60 = vpack.c.bf16 %v955_v63, %v955_v63  ;;  %v1283_v54 = vpack.c.bf16 %v956_v20, %v956_v20  ;;  %v1496_v55 = vpop.eup %1495 }
 0x13c   : > { %v1284_v40 = vpack.c.bf16 %v957_v32, %v957_v32  ;;  %v1285_v43 = vpack.c.bf16 %v958_v7, %v958_v7  ;;  %v930_v46 = vsel %vm704_vm3, %v1959_v53, 0.0  ;;  %v1286_v59 = vpack.c.bf16 %v959_v8, %v959_v8  ;;  %v1127_v7 = vld [vmem:[%s1918_s23 + $0x6c] sm:$0x1] }
 0x13d   : > { %1103 = vst.msk [vmem:[%s1918_s23 + $0x1c] sm:$0xf] %vm1090_vm5, %v1280_v24  ;;  %1104 = vst.msk [vmem:[%s1918_s23 + $0x20] sm:$0xf] %vm1090_vm5, %v1281_v28  ;;  %v931_v0 = vadd.f32 %v930_v46, %v929_v4  ;;  %v920_v15 = vadd.f32 %v919_v13, %v918_v33  ;;  %v932_v17 = vsel %vm704_vm3, %v1968_v58, 0.0  ;;  %v934_v19 = vsel %vm716_vm4, %v1496_v55, 0.0 }
 0x13e   : > { %1105 = vst.msk [vmem:[%s1918_s23 + $0x24] sm:$0xf] %vm1090_vm5, %v1282_v60  ;;  %1106 = vst.msk [vmem:[%s1918_s23 + $0x28] sm:$0xf] %vm1090_vm5, %v1283_v54  ;;  %v1110_v22 = vsel %vm1937_vm7, %v1286_v59, %v1109_v3 }
 0x13f   : > { %1107 = vst.msk [vmem:[%s1918_s23 + $0x2c] sm:$0xf] %vm1090_vm5, %v1284_v40  ;;  %1108 = vst.msk [vmem:[%s1918_s23 + $0x30] sm:$0xf] %vm1090_vm5, %v1285_v43  ;;  %v933_v18 = vadd.f32 %v932_v17, %v931_v0  ;;  %v921_v38 = vrot.slane %v920_v15, 1 }
 0x140   : > { %1111 = vst [vmem:[%s1918_s23 + $0x34] sm:$0x1] %v1110_v22 }
 0x141   : > { %v935_v6 = vadd.f32 %v934_v19, %v933_v18  ;;  %v922_v57 = vadd.f32 %v921_v38, %v920_v15 }
 0x143   : > { %v936_v44 = vrot.slane %v935_v6, 4  ;;  %1497 = vrcp.f32 %v922_v57 }
 0x145   : > { %v937_v23 = vadd.f32 %v936_v44, %v935_v6 }
 0x147   : > { %v938_v27 = vrot.slane %v937_v23, 2 }
 0x149   : > { %v939_v29 = vadd.f32 %v938_v27, %v937_v23 }
 0x14b   : > { %v940_v30 = vrot.slane %v939_v29, 1 }
 0x14d   : > { %v941_v50 = vadd.f32 %v940_v30, %v939_v29 }
 0x14f   : > { %1499 = vrcp.f32 %v941_v50 }
 0x150   : > { %v1498_v31 = vpop.eup %1497 }
 0x151   : > { %v960_v9 = vmul.f32 %v1498_v31, %v1878_v48  ;;  %v961_v11 = vmul.f32 %v1498_v31, %v1880_v56  ;;  %v962_v12 = vmul.f32 %v1498_v31, %v1886_v1  ;;  %v963_v16 = vmul.f32 %v1498_v31, %v1890_v2  ;;  %v1118_v1 = vld [vmem:[%s1918_s23 + $0x50] sm:$0x1] }
 0x152   : > { %v964_v5 = vmul.f32 %v1498_v31, %v1892_v10  ;;  %v965_v21 = vmul.f32 %v1498_v31, %v1896_v37  ;;  %v966_v34 = vmul.f32 %v1498_v31, %v1898_v25 }
 0x153   : > { %v1287_v39 = vpack.c.bf16 %v960_v9, %v960_v9  ;;  %v1288_v48 = vpack.c.bf16 %v961_v11, %v961_v11  ;;  %v1289_v36 = vpack.c.bf16 %v962_v12, %v962_v12  ;;  %v1290_v41 = vpack.c.bf16 %v963_v16, %v963_v16 }
 0x154   : > { %v1291_v56 = vpack.c.bf16 %v964_v5, %v964_v5  ;;  %v1292_v42 = vpack.c.bf16 %v965_v21, %v965_v21  ;;  %v1293_v52 = vpack.c.bf16 %v966_v34, %v966_v34 }
 0x155   : > { %1112 = vst.msk [vmem:[%s1918_s23 + $0x38] sm:$0xf] %vm1090_vm5, %v1287_v39  ;;  %1113 = vst.msk [vmem:[%s1918_s23 + $0x3c] sm:$0xf] %vm1090_vm5, %v1288_v48 }
 0x156   : > { %1114 = vst.msk [vmem:[%s1918_s23 + $0x40] sm:$0xf] %vm1090_vm5, %v1289_v36  ;;  %1115 = vst.msk [vmem:[%s1918_s23 + $0x44] sm:$0xf] %vm1090_vm5, %v1290_v41  ;;  %v1119_v2 = vsel %vm1937_vm7, %v1293_v52, %v1118_v1 }
 0x157   : > { %1116 = vst.msk [vmem:[%s1918_s23 + $0x48] sm:$0xf] %vm1090_vm5, %v1291_v56  ;;  %1117 = vst.msk [vmem:[%s1918_s23 + $0x4c] sm:$0xf] %vm1090_vm5, %v1292_v42 }
 0x158   : > { %1120 = vst [vmem:[%s1918_s23 + $0x50] sm:$0x1] %v1119_v2 }
 0x15c   : > { %v1500_v10 = vpop.eup %1499 }
 0x15d   : > { %v967_v37 = vmul.f32 %v1500_v10, %v1903_v35  ;;  %v968_v25 = vmul.f32 %v1500_v10, %v1905_v49  ;;  %v969_v45 = vmul.f32 %v1500_v10, %v1911_v51  ;;  %v970_v47 = vmul.f32 %v1500_v10, %v1933_v26 }
 0x15e   : > { %v971_v4 = vmul.f32 %v1500_v10, %v1959_v53  ;;  %v972_v61 = vmul.f32 %v1500_v10, %v1968_v58  ;;  %v973_v62 = vmul.f32 %v1500_v10, %v1496_v55 }
 0x15f   : > { %v1294_v63 = vpack.c.bf16 %v967_v37, %v967_v37  ;;  %v1295_v20 = vpack.c.bf16 %v968_v25, %v968_v25  ;;  %v1296_v35 = vpack.c.bf16 %v969_v45, %v969_v45  ;;  %v1297_v32 = vpack.c.bf16 %v970_v47, %v970_v47 }
 0x160   : > { %v1298_v49 = vpack.c.bf16 %v971_v4, %v971_v4  ;;  %v1299_v8 = vpack.c.bf16 %v972_v61, %v972_v61  ;;  %v1300_v33 = vpack.c.bf16 %v973_v62, %v973_v62 }
 0x161   : > { %1121 = vst.msk [vmem:[%s1918_s23 + $0x54] sm:$0xf] %vm1090_vm5, %v1294_v63  ;;  %1122 = vst.msk [vmem:[%s1918_s23 + $0x58] sm:$0xf] %vm1090_vm5, %v1295_v20 }
 0x162   : > { %1123 = vst.msk [vmem:[%s1918_s23 + $0x5c] sm:$0xf] %vm1090_vm5, %v1296_v35  ;;  %1124 = vst.msk [vmem:[%s1918_s23 + $0x60] sm:$0xf] %vm1090_vm5, %v1297_v32  ;;  %v1128_v51 = vsel %vm1937_vm7, %v1300_v33, %v1127_v7 }
 0x163   : > { %1125 = vst.msk [vmem:[%s1918_s23 + $0x64] sm:$0xf] %vm1090_vm5, %v1298_v49  ;;  %1126 = vst.msk [vmem:[%s1918_s23 + $0x68] sm:$0xf] %vm1090_vm5, %v1299_v8 }
 0x164   : > { %1129 = vst [vmem:[%s1918_s23 + $0x6c] sm:$0x1] %v1128_v51 }
 0x165 PF: > { %s12_s9 = sadd.s32 1, %s1507_s9  }
 0x166   : > { %p9_p4 = scmp.ge.s32.totalorder %s12_s9, 4  }
 0x168   :  { %11 = sbr.rel (!%p9_p4) target bundleno = 1 (0x1), region = 61 }

// kernel: _lambda_.3
= control target key start
LH: loop header
LB: loop body
LE: loop exit
PB: predicated region body
PF: predicated region fallthrough
CT: control target
= control target key end

     0   :  { %s2026_s18 = smov 0   ;;  %s2521_s0 = inlined_call_operand.vmem [shape: bf16[2,8,384], index: 0, kind: input, shape index: {}]   ;;  %s2522_s1 = inlined_call_operand.vmem [shape: bf16[2,49,384], index: 1, kind: input, shape index: {}]   ;;  %s2523_s2 = inlined_call_operand.vmem [shape: bf16[9,4,8], index: 2, kind: input, shape index: {}]   ;;  %s2524_s3 = inlined_call_operand.vmem [shape: bf16[9,4,49], index: 3, kind: input, shape index: {}]   ;;  %s2525_s4 = inlined_call_operand.vmem [shape: f32[4,1], index: 4, kind: input, shape index: {}]   ;;  %s2526_s5 = inlined_call_operand.vmem [shape: f32[2,4,256], index: 5, kind: output, shape index: {}]  }
   0x1 LB: > { %s1853_s19 = sadd.s32 4294967295, %s1985_s18   ;;  %p1857_p0 = scmp.ge.s32.totalorder %s1985_s18, 1  ;;  %s1985_s18 = sphi %s2026_s18, %s15_s18  }
   0x2   : > { %p197_p1 = scmp.lt.s32.totalorder %s1985_s18, 3 }
   0x4   : > { %p198_p2 = pnand %p1857_p0, %p197_p1 }
   0x5   : > { %p230_p3 = scmp.lt.s32.totalorder (!%p198_p2), %s1853_s19, 1  ;;  %s1988_s25 = smov (!%p198_p2), 127  }
   0x6   : > { %201 = sbr.rel (%p198_p2) target bundleno = 626 (0x272), region = 40  ;;  %s1989_s6 = smov (!%p198_p2), 126  }
   0x7   : > { %s1990_s9 = smov (!%p198_p2), 112   ;;  %s1991_s10 = smov (!%p198_p2), 111  }
   0x8   : > { %s1992_s11 = smov (!%p198_p2), 110   ;;  %s1993_s12 = smov (!%p198_p2), 96  }
   0x9   : > { %s1995_s26 = smov (!%p198_p2), 94  }
   0xb   : > { %v1987_v0 = vmov 0   ;;  %s2528_s19 = smov (!%p230_p3, %s1853_s19), 1  ;;  %vm265_vm0 = vcmask 1043456   ;;  %vm352_vm1 = vcmask 1040384   ;;  %v254_v17 = vld [vmem:[%s2523_s2] sm:$0x3] }
   0xc   : > { %304 = vmatprep.mubr.bf16.mxu0 %v1987_v0  ;;  %393 = vmatprep.mubr.bf16.mxu1 %v1987_v0  ;;  %s1936_s20 = smul.u32 84, %s2528_s19  ;;  %v2097_v16 = vsel %vm352_vm1, 65535, %v1987_v0  ;;  %vm261_vm2 = vcmask 64512   ;;  %vm348_vm3 = vcmask 400384   ;;  %v246_v25 = vld [vmem:[%s2524_s3] sm:$0x3] }
   0xd   : > { %1954 = vset.pattern.permute.xlu0 %v1987_v0  ;;  %s1935_s24 = smul.u32 12, %s2528_s19  ;;  %vm489_vm4 = vcmask 1039360   ;;  %vm654_vm5 = vcmask 1031168   ;;  %v1875_v51 = vld [vmem:[%s2524_s3 + $0x2] sm:$0x3]  ;;  %vm809_vm6 = vcmask 916480  }
   0xe   : > { %s2043_s23 = scalar_lea.vmem %s2522_s1, %s1936_s20  ;;  %vm964_vm7 = vcmask 908288   ;;  %vm1119_vm8 = vcmask 900096   ;;  %vm1274_vm9 = vcmask 785408   ;;  %vm1429_vm10 = vcmask 777216  }
   0xf   : > { %v416_v1 = vld [vmem:[%s2043_s23 + $0x48] sm:$0x11]  ;;  %v2051_v4 = vld [vmem:[%s2043_s23 + $0x50] ss:$0 sps:$4 sm:$0x11]   ;;  %s2067_s28 = scalar_lea.vmem %s2521_s0, %s1935_s24  ;;  %vm1584_vm11 = vcmask 769024  }
  0x10   : > { %v2046_v2 = vcombine.high %v416_v1, %v416_v1  ;;  %v2048_v3 = vcombine.low %v416_v1, %v416_v1  ;;  %v2059_v5 = vld [vmem:[%s2043_s23 + $0x34] ss:$12 sps:$4 sm:$0xff]   ;;  %v2062_v6 = vld [vmem:[%s2043_s23 + $0x38] ss:$12 sps:$4 sm:$0xff]   ;;  %v2070_v7 = vld [vmem:[%s2043_s23 + $0x30] ss:$12 sps:$4 sm:$0xff]  }
  0x11   : > { %v558_v8 = vld [vmem:[%s2067_s28] sm:$0xff]  ;;  %v2089_v12 = vld [vmem:[%s2043_s23 + $0x1c] ss:$12 sps:$4 sm:$0xff]  }
  0x12   : > { %485 = vrot.lane.b32.xlu0 %v2046_v2, %s1988_s25  ;;  %483 = vrot.lane.b32.xlu1 %v2048_v3, %s1988_s25  ;;  %v2077_v9 = vcombine.low %v558_v8, %v558_v8  ;;  %v2080_v10 = vld [vmem:[%s2043_s23 + $0x20] ss:$12 sps:$4 sm:$0xff]   ;;  %v2082_v11 = vcombine.high %v558_v8, %v558_v8  ;;  %v2108_v20 = vld [vmem:[%s2043_s23 + $0x18] ss:$12 sps:$4 sm:$0xff]  }
  0x13   : > { %v253_v14 = vld [vmem:[%s2043_s23 + $0x48] sm:$0x11]  ;;  %v2111_v21 = vld [vmem:[%s2043_s23 + $0x4] ss:$12 sps:$4 sm:$0xff]  }
  0x14   : > { %v267_v13 = vsel %vm265_vm0, %v2077_v9, 0  ;;  %1864 = vmatprep.subr.msk.bf16.mxu0 %vm265_vm0, %v2082_v11  ;;  %v1873_v15 = vcombine.high %v253_v14, %v253_v14  ;;  %v1872_v18 = vcombine.low %v253_v14, %v253_v14  ;;  %v2122_v23 = vld [vmem:[%s2043_s23 + $0x8] ss:$12 sps:$4 sm:$0xff]   ;;  %v2125_v24 = vld [vmem:[%s2043_s23] ss:$12 sps:$4 sm:$0xff]   ;;  %s1994_s23 = smov 95  }
  0x15   : > { %287 = vmatpush1.bf16.msra.mxu0 %v267_v13  ;;  %v2152_v26 = vld [vmem:[%s2067_s28 + $0x8] ss:$0 sps:$4 sm:$0xff]   ;;  %s1934_s28 = sshll.u32 %s2528_s19, 3 }
  0x16   : > { %487 = vrot.lane.b32.xlu0 %v2051_v4, %s1988_s25  ;;  %479 = vrot.lane.b32.xlu1 %v2059_v5, %s1988_s25  ;;  %v359_v19 = vand.u32 %v1873_v15, %v2097_v16  ;;  %v356_v22 = vand.u32 %v1872_v18, %v2097_v16 }
  0x18   : > { %1865 = vmatmul.mubr.msk.bf16.vlgmr.msra.gmra.mxu0 %vm261_vm2, %v254_v17  ;;  %369 = vmatprep.subr.bf16.mxu1 %v359_v19  ;;  %v1889_v19 = vld [vmem:[%s2523_s2 + $0x2] sm:$0x3] }
  0x19   : > { %370 = vmatpush1.bf16.msra.mxu1 %v356_v22  ;;  %545 = vmatprep.mubr.bf16.mxu0 %v1987_v0 }
  0x1a   : > { %481 = vrot.lane.b32.xlu0 %v2062_v6, %s1988_s25  ;;  %477 = vrot.lane.b32.xlu1 %v2070_v7, %s1988_s25 }
  0x1b   : > { %371 = vmatprep.subr.bf16.mxu1 %v2059_v5 }
  0x1d   : > { %372 = vmatpush1.bf16.msra.mxu1 %v2070_v7 }
  0x1e   : > { %475 = vrot.lane.b32.xlu1 %v2080_v10, %s1988_s25  ;;  %473 = vrot.lane.b32.xlu0 %v2089_v12, %s1988_s25 }
  0x1f   : > { %373 = vmatprep.subr.bf16.mxu1 %v2089_v12 }
  0x21   : > { %374 = vmatpush1.bf16.msra.mxu1 %v2108_v20 }
  0x22   : > { %471 = vrot.lane.b32.xlu0 %v2108_v20, %s1988_s25  ;;  %467 = vrot.lane.b32.xlu1 %v2111_v21, %s1988_s25 }
  0x23   : > { %375 = vmatprep.subr.bf16.mxu1 %v2111_v21 }
  0x25   : > { %376 = vmatpush1.bf16.msra.mxu1 %v2125_v24 }
  0x26   : > { %469 = vrot.lane.b32.xlu0 %v2122_v23, %s1988_s25  ;;  %465 = vrot.lane.b32.xlu1 %v2125_v24, %s1988_s25 }
  0x28   : > { %1874 = vmatmul.mubr.msk.bf16.vlgmr.msra.gmra.mxu1 %vm348_vm3, %v246_v25 }
  0x29   : > { %617 = vmatprep.mubr.bf16.mxu1 %v1987_v0 }
  0x2a   : > { %650 = vrot.lane.b32.xlu0 %v2046_v2, %s1989_s6  ;;  %652 = vrot.lane.b32.xlu1 %v2051_v4, %s1989_s6 }
  0x2e   : > { %648 = vrot.lane.b32.xlu0 %v2048_v3, %s1989_s6  ;;  %644 = vrot.lane.b32.xlu1 %v2059_v5, %s1989_s6 }
  0x32   : > { %646 = vrot.lane.b32.xlu0 %v2062_v6, %s1989_s6  ;;  %642 = vrot.lane.b32.xlu1 %v2070_v7, %s1989_s6 }
  0x36   : > { %570 = vrot.lane.b32.xlu1 %v2082_v11, %s1988_s25  ;;  %568 = vrot.lane.b32.xlu0 %v2077_v9, %s1988_s25 }
  0x3a   : > { %638 = vrot.lane.b32.xlu1 %v2089_v12, %s1989_s6  ;;  %572 = vrot.lane.b32.xlu0 %v2152_v26, %s1988_s25 }
  0x3e   : > { %636 = vrot.lane.b32.xlu1 %v2108_v20, %s1989_s6  ;;  %640 = vrot.lane.b32.xlu0 %v2080_v10, %s1989_s6 }
  0x42   : > { %634 = vrot.lane.b32.xlu1 %v2122_v23, %s1989_s6  ;;  %632 = vrot.lane.b32.xlu0 %v2111_v21, %s1989_s6 }
  0x46   : > { %723 = vrot.lane.b32.xlu1 %v2077_v9, %s1989_s6  ;;  %630 = vrot.lane.b32.xlu0 %v2125_v24, %s1989_s6 }
  0x4a   : > { %727 = vrot.lane.b32.xlu1 %v2152_v26, %s1989_s6  ;;  %725 = vrot.lane.b32.xlu0 %v2082_v11, %s1989_s6  ;;  %s244_s6 = scalar_lea.vmem %s2526_s5, %s1934_s28 }
  0x4e   : > { %807 = vrot.lane.b32.xlu1 %v2051_v4, %s1990_s9  ;;  %805 = vrot.lane.b32.xlu0 %v2046_v2, %s1990_s9 }
  0x52   : > { %878 = vrot.lane.b32.xlu1 %v2077_v9, %s1990_s9  ;;  %803 = vrot.lane.b32.xlu0 %v2048_v3, %s1990_s9 }
  0x56   : > { %882 = vrot.lane.b32.xlu1 %v2152_v26, %s1990_s9  ;;  %880 = vrot.lane.b32.xlu0 %v2082_v11, %s1990_s9 }
  0x5a   : > { %801 = vrot.lane.b32.xlu1 %v2062_v6, %s1990_s9  ;;  %799 = vrot.lane.b32.xlu0 %v2059_v5, %s1990_s9 }
  0x5e   : > { %962 = vrot.lane.b32.xlu1 %v2051_v4, %s1991_s10  ;;  %960 = vrot.lane.b32.xlu0 %v2046_v2, %s1991_s10 }
  0x62   : > { %958 = vrot.lane.b32.xlu1 %v2048_v3, %s1991_s10  ;;  %797 = vrot.lane.b32.xlu0 %v2070_v7, %s1990_s9 }
  0x66   : > { %795 = vrot.lane.b32.xlu1 %v2080_v10, %s1990_s9  ;;  %793 = vrot.lane.b32.xlu0 %v2089_v12, %s1990_s9 }
  0x6a   : > { %954 = vrot.lane.b32.xlu1 %v2059_v5, %s1991_s10  ;;  %791 = vrot.lane.b32.xlu0 %v2108_v20, %s1990_s9 }
  0x6e   : > { %952 = vrot.lane.b32.xlu1 %v2070_v7, %s1991_s10  ;;  %956 = vrot.lane.b32.xlu0 %v2062_v6, %s1991_s10 }
  0x72   : > { %789 = vrot.lane.b32.xlu1 %v2122_v23, %s1990_s9  ;;  %787 = vrot.lane.b32.xlu0 %v2111_v21, %s1990_s9 }
  0x76   : > { %948 = vrot.lane.b32.xlu1 %v2089_v12, %s1991_s10  ;;  %785 = vrot.lane.b32.xlu0 %v2125_v24, %s1990_s9 }
  0x7a   : > { %946 = vrot.lane.b32.xlu1 %v2108_v20, %s1991_s10  ;;  %950 = vrot.lane.b32.xlu0 %v2080_v10, %s1991_s10 }
  0x7e   : > { %944 = vrot.lane.b32.xlu1 %v2122_v23, %s1991_s10  ;;  %942 = vrot.lane.b32.xlu0 %v2111_v21, %s1991_s10 }
  0x82   : > { %1033 = vrot.lane.b32.xlu1 %v2077_v9, %s1991_s10  ;;  %940 = vrot.lane.b32.xlu0 %v2125_v24, %s1991_s10 }
  0x84   : > { %v486_v27 = vpop.permute.xlu0 %485  ;;  %v484_v28 = vpop.permute.xlu1 %483 }
  0x85   : > { %v496_v29 = vsel %vm489_vm4, %v484_v28, %v486_v27 }
  0x86   : > { %1037 = vrot.lane.b32.xlu1 %v2152_v26, %s1991_s10  ;;  %1035 = vrot.lane.b32.xlu0 %v2082_v11, %s1991_s10  ;;  %v508_v34 = vand.u32 %v496_v29, %v2097_v16 }
  0x88   : > { %v488_v30 = vpop.permute.xlu0 %487  ;;  %v480_v31 = vpop.permute.xlu1 %479 }
  0x89   : > { %v497_v32 = vsel %vm489_vm4, %v486_v27, %v488_v30 }
  0x8a   : > { %v511_v33 = vand.u32 %v497_v32, %v2097_v16  ;;  %1117 = vrot.lane.b32.xlu1 %v2051_v4, %s1992_s11  ;;  %1115 = vrot.lane.b32.xlu0 %v2046_v2, %s1992_s11 }
  0x8c   : > { %v482_v35 = vpop.permute.xlu0 %481  ;;  %v478_v36 = vpop.permute.xlu1 %477  ;;  %521 = vmatprep.subr.bf16.mxu0 %v511_v33 }
  0x8d   : > { %522 = vmatpush1.bf16.msra.mxu0 %v508_v34  ;;  %v495_v37 = vsel %vm489_vm4, %v480_v31, %v482_v35  ;;  %v494_v38 = vsel %vm489_vm4, %v478_v36, %v480_v31  ;;  %v1895_v35 = vld [vmem:[%s2524_s3 + $0x4] sm:$0x3] }
  0x8e   : > { %1188 = vrot.lane.b32.xlu1 %v2077_v9, %s1992_s11  ;;  %1113 = vrot.lane.b32.xlu0 %v2048_v3, %s1992_s11 }
  0x8f   : > { %523 = vmatprep.subr.bf16.mxu0 %v495_v37 }
  0x90   : > { %v476_v39 = vpop.permute.xlu1 %475  ;;  %v474_v40 = vpop.permute.xlu0 %473 }
  0x91   : > { %524 = vmatpush1.bf16.msra.mxu0 %v494_v38  ;;  %v493_v41 = vsel %vm489_vm4, %v474_v40, %v476_v39 }
  0x92   : > { %1192 = vrot.lane.b32.xlu1 %v2152_v26, %s1992_s11  ;;  %1190 = vrot.lane.b32.xlu0 %v2082_v11, %s1992_s11 }
  0x93   : > { %525 = vmatprep.subr.bf16.mxu0 %v493_v41  ;;  %v1897_v41 = vld [vmem:[%s2523_s2 + $0x4] sm:$0x3] }
  0x94   : > { %v472_v42 = vpop.permute.xlu0 %471  ;;  %v468_v43 = vpop.permute.xlu1 %467 }
  0x95   : > { %v492_v44 = vsel %vm489_vm4, %v472_v42, %v474_v40 }
  0x96   : > { %1111 = vrot.lane.b32.xlu1 %v2062_v6, %s1992_s11  ;;  %1109 = vrot.lane.b32.xlu0 %v2059_v5, %s1992_s11 }
  0x97   : > { %526 = vmatpush1.bf16.msra.mxu0 %v492_v44 }
  0x98   : > { %v470_v45 = vpop.permute.xlu0 %469  ;;  %v466_v46 = vpop.permute.xlu1 %465 }
  0x99   : > { %v490_v47 = vsel %vm489_vm4, %v466_v46, %v468_v43  ;;  %v491_v48 = vsel %vm489_vm4, %v468_v43, %v470_v45 }
  0x9a   : > { %1272 = vrot.lane.b32.xlu1 %v2051_v4, %s1993_s12  ;;  %1270 = vrot.lane.b32.xlu0 %v2046_v2, %s1993_s12 }
  0x9b   : > { %527 = vmatprep.subr.bf16.mxu0 %v491_v48 }
  0x9c   : > { %528 = vmatpush1.bf16.msra.mxu0 %v490_v47  ;;  %v651_v49 = vpop.permute.xlu0 %650  ;;  %v653_v50 = vpop.permute.xlu1 %652 }
  0x9d   : > { %v662_v52 = vsel %vm654_vm5, %v651_v49, %v653_v50 }
  0x9e   : > { %v676_v53 = vand.u32 %v662_v52, %v2097_v16  ;;  %1268 = vrot.lane.b32.xlu1 %v2048_v3, %s1993_s12  ;;  %1107 = vrot.lane.b32.xlu0 %v2070_v7, %s1992_s11 }
  0x9f   : > { %1888 = vmatmul.mubr.msk.bf16.vlgmr.msra.gmra.mxu0 %vm348_vm3, %v1875_v51 }
  0xa0   : > { %v649_v54 = vpop.permute.xlu0 %648  ;;  %v645_v55 = vpop.permute.xlu1 %644  ;;  %686 = vmatprep.subr.bf16.mxu0 %v676_v53  ;;  %710 = vmatprep.mubr.bf16.mxu0 %v1987_v0 }
  0xa1   : > { %v661_v56 = vsel %vm654_vm5, %v649_v54, %v651_v49 }
  0xa2   : > { %v673_v57 = vand.u32 %v661_v56, %v2097_v16  ;;  %1105 = vrot.lane.b32.xlu1 %v2080_v10, %s1992_s11  ;;  %1103 = vrot.lane.b32.xlu0 %v2089_v12, %s1992_s11 }
  0xa4   : > { %v647_v58 = vpop.permute.xlu0 %646  ;;  %v643_v59 = vpop.permute.xlu1 %642  ;;  %687 = vmatpush1.bf16.msra.mxu0 %v673_v57 }
  0xa5   : > { %v660_v60 = vsel %vm654_vm5, %v645_v55, %v647_v58  ;;  %v659_v61 = vsel %vm654_vm5, %v643_v59, %v645_v55  ;;  %v1902_v55 = vld [vmem:[%s2523_s2 + $0x6] sm:$0x3] }
  0xa6   : > { %1264 = vrot.lane.b32.xlu1 %v2059_v5, %s1993_s12  ;;  %1101 = vrot.lane.b32.xlu0 %v2108_v20, %s1992_s11 }
  0xa7   : > { %688 = vmatprep.subr.bf16.mxu0 %v660_v60 }
  0xa8   : > { %v571_v62 = vpop.permute.xlu1 %570  ;;  %v569_v63 = vpop.permute.xlu0 %568  ;;  %689 = vmatpush1.bf16.msra.mxu0 %v659_v61 }
  0xa9   : > { %v574_v1 = vsel %vm489_vm4, %v569_v63, %v571_v62 }
  0xaa   : > { %1262 = vrot.lane.b32.xlu1 %v2070_v7, %s1993_s12  ;;  %1266 = vrot.lane.b32.xlu0 %v2062_v6, %s1993_s12  ;;  %v580_v15 = vsel %vm265_vm0, %v574_v1, 0 }
  0xac   : > { %v639_v8 = vpop.permute.xlu1 %638  ;;  %v573_v13 = vpop.permute.xlu0 %572 }
  0xad   : > { %v575_v14 = vsel %vm489_vm4, %v571_v62, %v573_v13 }
  0xae   : > { %1099 = vrot.lane.b32.xlu1 %v2122_v23, %s1992_s11  ;;  %1097 = vrot.lane.b32.xlu0 %v2111_v21, %s1992_s11 }
  0xaf   : > { %1893 = vmatprep.subr.msk.bf16.mxu1 %vm265_vm0, %v575_v14 }
  0xb0   : > { %600 = vmatpush1.bf16.msra.mxu1 %v580_v15  ;;  %v637_v17 = vpop.permute.xlu1 %636  ;;  %v641_v18 = vpop.permute.xlu0 %640 }
  0xb1   : > { %v657_v22 = vsel %vm654_vm5, %v637_v17, %v639_v8  ;;  %v658_v25 = vsel %vm654_vm5, %v639_v8, %v641_v18 }
  0xb2   : > { %1258 = vrot.lane.b32.xlu1 %v2089_v12, %s1993_s12  ;;  %1095 = vrot.lane.b32.xlu0 %v2125_v24, %s1992_s11 }
  0xb3   : > { %690 = vmatprep.subr.bf16.mxu0 %v658_v25  ;;  %1894 = vmatmul.mubr.msk.bf16.vlgmr.msra.gmra.mxu1 %vm261_vm2, %v1889_v19 }
  0xb4   : > { %691 = vmatpush1.bf16.msra.mxu0 %v657_v22  ;;  %v635_v27 = vpop.permute.xlu1 %634  ;;  %v633_v28 = vpop.permute.xlu0 %632  ;;  %772 = vmatprep.mubr.bf16.mxu1 %v1987_v0 }
  0xb5   : > { %v656_v29 = vsel %vm654_vm5, %v633_v28, %v635_v27 }
  0xb6   : > { %1256 = vrot.lane.b32.xlu1 %v2108_v20, %s1993_s12  ;;  %1260 = vrot.lane.b32.xlu0 %v2080_v10, %s1993_s12 }
  0xb7   : > { %692 = vmatprep.subr.bf16.mxu0 %v656_v29 }
  0xb8   : > { %v724_v30 = vpop.permute.xlu1 %723  ;;  %v631_v31 = vpop.permute.xlu0 %630 }
  0xb9   : > { %v655_v32 = vsel %vm654_vm5, %v631_v31, %v633_v28 }
  0xba   : > { %1254 = vrot.lane.b32.xlu1 %v2122_v23, %s1993_s12  ;;  %1252 = vrot.lane.b32.xlu0 %v2111_v21, %s1993_s12 }
  0xbb   : > { %693 = vmatpush1.bf16.msra.mxu0 %v655_v32 }
  0xbc   : > { %v728_v33 = vpop.permute.xlu1 %727  ;;  %v726_v34 = vpop.permute.xlu0 %725 }
  0xbd   : > { %v729_v36 = vsel %vm654_vm5, %v724_v30, %v726_v34  ;;  %v730_v37 = vsel %vm654_vm5, %v726_v34, %v728_v33 }
  0xbe   : > { %v735_v38 = vsel %vm265_vm0, %v729_v36, 0  ;;  %1343 = vrot.lane.b32.xlu1 %v2077_v9, %s1993_s12  ;;  %1250 = vrot.lane.b32.xlu0 %v2125_v24, %s1993_s12 }
  0xbf   : > { %1898 = vmatprep.subr.msk.bf16.mxu1 %vm265_vm0, %v730_v37  ;;  %1896 = vmatmul.mubr.msk.bf16.vlgmr.msra.gmra.mxu0 %vm348_vm3, %v1895_v35 }
  0xc0   : > { %755 = vmatpush1.bf16.msra.mxu1 %v735_v38  ;;  %v808_v39 = vpop.permute.xlu1 %807  ;;  %v806_v40 = vpop.permute.xlu0 %805  ;;  %927 = vmatprep.mubr.bf16.mxu0 %v1987_v0 }
  0xc1   : > { %v817_v42 = vsel %vm809_vm6, %v806_v40, %v808_v39 }
  0xc2   : > { %v831_v43 = vand.u32 %v817_v42, %v2097_v16  ;;  %1347 = vrot.lane.b32.xlu1 %v2152_v26, %s1993_s12  ;;  %1345 = vrot.lane.b32.xlu0 %v2082_v11, %s1993_s12 }
  0xc3   : > { %1899 = vmatmul.mubr.msk.bf16.vlgmr.msra.gmra.mxu1 %vm261_vm2, %v1897_v41 }
  0xc4   : > { %v879_v44 = vpop.permute.xlu1 %878  ;;  %841 = vmatprep.subr.bf16.mxu1 %v831_v43  ;;  %v804_v45 = vpop.permute.xlu0 %803  ;;  %865 = vmatprep.mubr.bf16.mxu1 %v1987_v0 }
  0xc5   : > { %v816_v46 = vsel %vm809_vm6, %v804_v45, %v806_v40 }
  0xc6   : > { %v828_v47 = vand.u32 %v816_v46, %v2097_v16  ;;  %1427 = vrot.lane.b32.xlu1 %v2051_v4, %s1994_s23  ;;  %1425 = vrot.lane.b32.xlu0 %v2046_v2, %s1994_s23 }
  0xc8   : > { %v883_v48 = vpop.permute.xlu1 %882  ;;  %842 = vmatpush1.bf16.msra.mxu1 %v828_v47  ;;  %v881_v49 = vpop.permute.xlu0 %880 }
  0xc9   : > { %v884_v50 = vsel %vm809_vm6, %v879_v44, %v881_v49  ;;  %v885_v51 = vsel %vm809_vm6, %v881_v49, %v883_v48 }
  0xca   : > { %v890_v52 = vsel %vm265_vm0, %v884_v50, 0  ;;  %1498 = vrot.lane.b32.xlu1 %v2077_v9, %s1994_s23  ;;  %1423 = vrot.lane.b32.xlu0 %v2048_v3, %s1994_s23 }
  0xcb   : > { %1903 = vmatprep.subr.msk.bf16.mxu0 %vm265_vm0, %v885_v51  ;;  %v1907_v51 = vld [vmem:[%s2523_s2 + $0x8] sm:$0x3] }
  0xcc   : > { %910 = vmatpush1.bf16.msra.mxu0 %v890_v52  ;;  %v802_v53 = vpop.permute.xlu1 %801  ;;  %v800_v54 = vpop.permute.xlu0 %799 }
  0xcd   : > { %v815_v56 = vsel %vm809_vm6, %v800_v54, %v802_v53 }
  0xce   : > { %1502 = vrot.lane.b32.xlu1 %v2152_v26, %s1994_s23  ;;  %1500 = vrot.lane.b32.xlu0 %v2082_v11, %s1994_s23 }
  0xcf   : > { %843 = vmatprep.subr.bf16.mxu1 %v815_v56  ;;  %1904 = vmatmul.mubr.msk.bf16.vlgmr.msra.gmra.mxu0 %vm261_vm2, %v1902_v55 }
  0xd0   : > { %v963_v57 = vpop.permute.xlu1 %962  ;;  %v961_v58 = vpop.permute.xlu0 %960  ;;  %1020 = vmatprep.mubr.bf16.mxu0 %v1987_v0 }
  0xd1   : > { %v972_v59 = vsel %vm964_vm7, %v961_v58, %v963_v57 }
  0xd2   : > { %v986_v60 = vand.u32 %v972_v59, %v2097_v16  ;;  %1421 = vrot.lane.b32.xlu1 %v2062_v6, %s1994_s23  ;;  %1419 = vrot.lane.b32.xlu0 %v2059_v5, %s1994_s23 }
  0xd4   : > { %v959_v61 = vpop.permute.xlu1 %958  ;;  %v798_v62 = vpop.permute.xlu0 %797  ;;  %996 = vmatprep.subr.bf16.mxu0 %v986_v60 }
  0xd5   : > { %v971_v63 = vsel %vm964_vm7, %v959_v61, %v961_v58  ;;  %v814_v1 = vsel %vm809_vm6, %v798_v62, %v800_v54  ;;  %v1713_v54 = vld [vmem:[%s2525_s4] sm:$0xf]  ;;  %v1912_v62 = vld [vmem:[%s2523_s2 + $0xa] sm:$0x3] }
  0xd6   : > { %v983_v8 = vand.u32 %v971_v63, %v2097_v16  ;;  %1582 = vrot.lane.b32.xlu1 %v2051_v4, %s1995_s26  ;;  %1580 = vrot.lane.b32.xlu0 %v2046_v2, %s1995_s26 }
  0xd7   : > { %844 = vmatpush1.bf16.msra.mxu1 %v814_v1 }
  0xd8   : > { %v796_v13 = vpop.permute.xlu1 %795  ;;  %v794_v14 = vpop.permute.xlu0 %793  ;;  %997 = vmatpush1.bf16.msra.mxu0 %v983_v8 }
  0xd9   : > { %v813_v15 = vsel %vm809_vm6, %v794_v14, %v796_v13  ;;  %v306_v39 = vpop.f32.mrf.mxu0 }
  0xda   : > { %1578 = vrot.lane.b32.xlu1 %v2048_v3, %s1995_s26  ;;  %1417 = vrot.lane.b32.xlu0 %v2070_v7, %s1994_s23 }
  0xdb   : > { %845 = vmatprep.subr.bf16.mxu1 %v813_v15  ;;  %v308_v45 = vpop.f32.mrf.mxu0 }
  0xdc   : > { %v955_v17 = vpop.permute.xlu1 %954  ;;  %v792_v18 = vpop.permute.xlu0 %791 }
  0xdd   : > { %v812_v4 = vsel %vm809_vm6, %v792_v18, %v794_v14  ;;  %v310_v47 = vpop.f32.mrf.mxu0 }
  0xde   : > { %1415 = vrot.lane.b32.xlu1 %v2080_v10, %s1994_s23  ;;  %1413 = vrot.lane.b32.xlu0 %v2089_v12, %s1994_s23 }
  0xdf   : > { %846 = vmatpush1.bf16.msra.mxu1 %v812_v4 }
  0xe0   : > { %v953_v2 = vpop.permute.xlu1 %952  ;;  %v957_v19 = vpop.permute.xlu0 %956 }
  0xe1   : > { %v969_v22 = vsel %vm964_vm7, %v953_v2, %v955_v17  ;;  %v970_v3 = vsel %vm964_vm7, %v955_v17, %v957_v19 }
  0xe2   : > { %1574 = vrot.lane.b32.xlu1 %v2059_v5, %s1995_s26  ;;  %1411 = vrot.lane.b32.xlu0 %v2108_v20, %s1994_s23 }
  0xe3   : > { %998 = vmatprep.subr.bf16.mxu0 %v970_v3 }
  0xe4   : > { %999 = vmatpush1.bf16.msra.mxu0 %v969_v22  ;;  %v790_v25 = vpop.permute.xlu1 %789  ;;  %v788_v27 = vpop.permute.xlu0 %787 }
  0xe5   : > { %v811_v28 = vsel %vm809_vm6, %v788_v27, %v790_v25 }
  0xe6   : > { %1572 = vrot.lane.b32.xlu1 %v2070_v7, %s1995_s26  ;;  %1576 = vrot.lane.b32.xlu0 %v2062_v6, %s1995_s26  ;;  %v1900_v7 = vld [vmem:[%s2524_s3 + $0x6] sm:$0x3] }
  0xe7   : > { %847 = vmatprep.subr.bf16.mxu1 %v811_v28 }
  0xe8   : > { %v949_v29 = vpop.permute.xlu1 %948  ;;  %v786_v30 = vpop.permute.xlu0 %785 }
  0xe9   : > { %v810_v5 = vsel %vm809_vm6, %v786_v30, %v788_v27  ;;  %v395_v40 = vpop.f32.mrf.mxu1 }
  0xea   : > { %1409 = vrot.lane.b32.xlu1 %v2122_v23, %s1994_s23  ;;  %1407 = vrot.lane.b32.xlu0 %v2111_v21, %s1994_s23  ;;  %v2389_v41 = vadd.f32 %v395_v40, %v306_v39 }
  0xeb   : > { %848 = vmatpush1.bf16.msra.mxu1 %v810_v5 }
  0xec   : > { %v947_v31 = vpop.permute.xlu1 %946  ;;  %v951_v32 = vpop.permute.xlu0 %950 }
  0xed   : > { %v967_v6 = vsel %vm964_vm7, %v947_v31, %v949_v29  ;;  %v968_v33 = vsel %vm964_vm7, %v949_v29, %v951_v32 }
  0xee   : > { %1568 = vrot.lane.b32.xlu1 %v2089_v12, %s1995_s26  ;;  %1405 = vrot.lane.b32.xlu0 %v2125_v24, %s1994_s23 }
  0xef   : > { %1000 = vmatprep.subr.bf16.mxu0 %v968_v33  ;;  %1901 = vmatmul.mubr.msk.bf16.vlgmr.msra.gmra.mxu1 %vm348_vm3, %v1900_v7 }
  0xf0   : > { %1001 = vmatpush1.bf16.msra.mxu0 %v967_v6  ;;  %v945_v34 = vpop.permute.xlu1 %944  ;;  %v943_v35 = vpop.permute.xlu0 %942  ;;  %1082 = vmatprep.mubr.bf16.mxu1 %v1987_v0 }
  0xf1   : > { %v966_v36 = vsel %vm964_vm7, %v943_v35, %v945_v34 }
  0xf2   : > { %1566 = vrot.lane.b32.xlu1 %v2108_v20, %s1995_s26  ;;  %1570 = vrot.lane.b32.xlu0 %v2080_v10, %s1995_s26  ;;  %v1905_v10 = vld [vmem:[%s2524_s3 + $0x8] sm:$0x3] }
  0xf3   : > { %1002 = vmatprep.subr.bf16.mxu0 %v966_v36 }
  0xf4   : > { %v1034_v12 = vpop.permute.xlu1 %1033  ;;  %v941_v37 = vpop.permute.xlu0 %940 }
  0xf5   : > { %v965_v38 = vsel %vm964_vm7, %v941_v37, %v943_v35  ;;  %v1910_v37 = vld [vmem:[%s2524_s3 + $0xa] sm:$0x3] }
  0xf6   : > { %1564 = vrot.lane.b32.xlu1 %v2122_v23, %s1995_s26  ;;  %1562 = vrot.lane.b32.xlu0 %v2111_v21, %s1995_s26  ;;  %v397_v23 = vpop.f32.mrf.mxu1 }
  0xf7   : > { %1003 = vmatpush1.bf16.msra.mxu0 %v965_v38  ;;  %v2401_v21 = vadd.f32 %v397_v23, %v308_v45 }
  0xf8   : > { %v1038_v20 = vpop.permute.xlu1 %1037  ;;  %v1036_v42 = vpop.permute.xlu0 %1035 }
  0xf9   : > { %v1039_v43 = vsel %vm964_vm7, %v1034_v12, %v1036_v42  ;;  %v1040_v44 = vsel %vm964_vm7, %v1036_v42, %v1038_v20  ;;  %v399_v48 = vpop.f32.mrf.mxu1 }
  0xfa   : > { %v1045_v46 = vsel %vm265_vm0, %v1039_v43, 0  ;;  %1653 = vrot.lane.b32.xlu1 %v2077_v9, %s1995_s26  ;;  %1560 = vrot.lane.b32.xlu0 %v2125_v24, %s1995_s26  ;;  %v311_v24 = vpop.f32.mrf.mxu0 }
  0xfb   : > { %1908 = vmatprep.subr.msk.bf16.mxu1 %vm265_vm0, %v1040_v44  ;;  %1906 = vmatmul.mubr.msk.bf16.vlgmr.msra.gmra.mxu0 %vm348_vm3, %v1905_v10  ;;  %v400_v52 = vpop.f32.mrf.mxu1 }
  0xfc   : > { %1065 = vmatpush1.bf16.msra.mxu1 %v1045_v46  ;;  %v1118_v49 = vpop.permute.xlu1 %1117  ;;  %v1116_v50 = vpop.permute.xlu0 %1115  ;;  %1237 = vmatprep.mubr.bf16.mxu0 %v1987_v0  ;;  %v1915_v46 = vld [vmem:[%s2524_s3 + $0xc] sm:$0x3] }
  0xfd   : > { %v1127_v9 = vsel %vm1119_vm8, %v1116_v50, %v1118_v49 }
  0xfe   : > { %v1141_v53 = vand.u32 %v1127_v9, %v2097_v16  ;;  %1657 = vrot.lane.b32.xlu1 %v2152_v26, %s1995_s26  ;;  %1655 = vrot.lane.b32.xlu0 %v2082_v11, %s1995_s26  ;;  %v1917_v9 = vld [vmem:[%s2523_s2 + $0xc] sm:$0x3] }
  0xff   : > { %1909 = vmatmul.mubr.msk.bf16.vlgmr.msra.gmra.mxu1 %vm261_vm2, %v1907_v51 }
 0x100   : > { %v1189_v55 = vpop.permute.xlu1 %1188  ;;  %1151 = vmatprep.subr.bf16.mxu1 %v1141_v53  ;;  %v1114_v56 = vpop.permute.xlu0 %1113  ;;  %1175 = vmatprep.mubr.bf16.mxu1 %v1987_v0 }
 0x101   : > { %v1126_v57 = vsel %vm1119_vm8, %v1114_v56, %v1116_v50 }
 0x102   : > { %v1138_v58 = vand.u32 %v1126_v57, %v2097_v16  ;;  %1716 = vperm.xlu0 %1954, %v1713_v54  }
 0x104   : > { %v1193_v26 = vpop.permute.xlu1 %1192  ;;  %1152 = vmatpush1.bf16.msra.mxu1 %v1138_v58  ;;  %v1191_v59 = vpop.permute.xlu0 %1190 }
 0x105   : > { %v1194_v11 = vsel %vm1119_vm8, %v1189_v55, %v1191_v59  ;;  %v1195_v60 = vsel %vm1119_vm8, %v1191_v59, %v1193_v26 }
 0x106   : > { %v1200_v61 = vsel %vm265_vm0, %v1194_v11, 0  ;;  %1913 = vmatprep.subr.msk.bf16.mxu0 %vm265_vm0, %v1195_v60 }
 0x107   : > { %1220 = vmatpush1.bf16.msra.mxu0 %v1200_v61 }
 0x108   : > { %v1112_v63 = vpop.permute.xlu1 %1111  ;;  %v1110_v1 = vpop.permute.xlu0 %1109 }
 0x109   : > { %v1125_v8 = vsel %vm1119_vm8, %v1110_v1, %v1112_v63 }
 0x10a   : > { %1153 = vmatprep.subr.bf16.mxu1 %v1125_v8  ;;  %1914 = vmatmul.mubr.msk.bf16.vlgmr.msra.gmra.mxu0 %vm261_vm2, %v1912_v62  ;;  %v1922_v62 = vld [vmem:[%s2523_s2 + $0xe] sm:$0x3] }
 0x10b   : > { %1330 = vmatprep.mubr.bf16.mxu0 %v1987_v0 }
 0x10c   : > { %v1273_v13 = vpop.permute.xlu1 %1272  ;;  %v1271_v14 = vpop.permute.xlu0 %1270 }
 0x10d   : > { %v1282_v15 = vsel %vm1274_vm9, %v1271_v14, %v1273_v13 }
 0x10e   : > { %v1296_v17 = vand.u32 %v1282_v15, %v2097_v16 }
 0x110   : > { %v1269_v18 = vpop.permute.xlu1 %1268  ;;  %v1108_v4 = vpop.permute.xlu0 %1107  ;;  %1306 = vmatprep.subr.bf16.mxu0 %v1296_v17 }
 0x111   : > { %v1281_v2 = vsel %vm1274_vm9, %v1269_v18, %v1271_v14  ;;  %v1124_v19 = vsel %vm1119_vm8, %v1108_v4, %v1110_v1 }
 0x112   : > { %v1293_v22 = vand.u32 %v1281_v2, %v2097_v16  ;;  %1154 = vmatpush1.bf16.msra.mxu1 %v1124_v19 }
 0x114   : > { %v1106_v3 = vpop.permute.xlu1 %1105  ;;  %v1104_v25 = vpop.permute.xlu0 %1103  ;;  %1307 = vmatpush1.bf16.msra.mxu0 %v1293_v22 }
 0x115   : > { %v1123_v27 = vsel %vm1119_vm8, %v1104_v25, %v1106_v3 }
 0x116   : > { %1155 = vmatprep.subr.bf16.mxu1 %v1123_v27 }
 0x118   : > { %v1265_v28 = vpop.permute.xlu1 %1264  ;;  %v1102_v29 = vpop.permute.xlu0 %1101 }
 0x119   : > { %v1122_v30 = vsel %vm1119_vm8, %v1102_v29, %v1104_v25 }
 0x11a   : > { %1156 = vmatpush1.bf16.msra.mxu1 %v1122_v30 }
 0x11c   : > { %v1263_v5 = vpop.permute.xlu1 %1262  ;;  %v1267_v31 = vpop.permute.xlu0 %1266 }
 0x11d   : > { %v1279_v32 = vsel %vm1274_vm9, %v1263_v5, %v1265_v28  ;;  %v1280_v7 = vsel %vm1274_vm9, %v1265_v28, %v1267_v31 }
 0x11e   : > { %1308 = vmatprep.subr.bf16.mxu0 %v1280_v7 }
 0x11f   : > { %1309 = vmatpush1.bf16.msra.mxu0 %v1279_v32 }
 0x120   : > { %v1100_v6 = vpop.permute.xlu1 %1099  ;;  %v1098_v33 = vpop.permute.xlu0 %1097 }
 0x121   : > { %v1121_v34 = vsel %vm1119_vm8, %v1098_v33, %v1100_v6 }
 0x122   : > { %1157 = vmatprep.subr.bf16.mxu1 %v1121_v34 }
 0x124   : > { %v1259_v35 = vpop.permute.xlu1 %1258  ;;  %v1096_v36 = vpop.permute.xlu0 %1095 }
 0x125   : > { %v1120_v12 = vsel %vm1119_vm8, %v1096_v36, %v1098_v33 }
 0x126   : > { %1158 = vmatpush1.bf16.msra.mxu1 %v1120_v12 }
 0x128   : > { %v1257_v38 = vpop.permute.xlu1 %1256  ;;  %v1261_v39 = vpop.permute.xlu0 %1260 }
 0x129   : > { %v1277_v40 = vsel %vm1274_vm9, %v1257_v38, %v1259_v35  ;;  %1911 = vmatmul.mubr.msk.bf16.vlgmr.msra.gmra.mxu1 %vm348_vm3, %v1910_v37  ;;  %v1278_v20 = vsel %vm1274_vm9, %v1259_v35, %v1261_v39  ;;  %v1920_v39 = vld [vmem:[%s2524_s3 + $0xe] sm:$0x3] }
 0x12a   : > { %1310 = vmatprep.subr.bf16.mxu0 %v1278_v20  ;;  %1392 = vmatprep.mubr.bf16.mxu1 %v1987_v0 }
 0x12b   : > { %1311 = vmatpush1.bf16.msra.mxu0 %v1277_v40 }
 0x12c   : > { %v1255_v42 = vpop.permute.xlu1 %1254  ;;  %v1253_v10 = vpop.permute.xlu0 %1252 }
 0x12d   : > { %v1276_v43 = vsel %vm1274_vm9, %v1253_v10, %v1255_v42 }
 0x12e   : > { %1312 = vmatprep.subr.bf16.mxu0 %v1276_v43 }
 0x130   : > { %v1344_v44 = vpop.permute.xlu1 %1343  ;;  %v1251_v45 = vpop.permute.xlu0 %1250 }
 0x131   : > { %v1275_v23 = vsel %vm1274_vm9, %v1251_v45, %v1253_v10 }
 0x132   : > { %1313 = vmatpush1.bf16.msra.mxu0 %v1275_v23 }
 0x134   : > { %v1348_v47 = vpop.permute.xlu1 %1347  ;;  %v1346_v48 = vpop.permute.xlu0 %1345 }
 0x135   : > { %v1349_v49 = vsel %vm1274_vm9, %v1344_v44, %v1346_v48  ;;  %v1350_v50 = vsel %vm1274_vm9, %v1346_v48, %v1348_v47  ;;  %1916 = vmatmul.mubr.msk.bf16.vlgmr.msra.gmra.mxu0 %vm348_vm3, %v1915_v46 }
 0x136   : > { %v1355_v51 = vsel %vm265_vm0, %v1349_v49, 0  ;;  %1918 = vmatprep.subr.msk.bf16.mxu1 %vm265_vm0, %v1350_v50  ;;  %1547 = vmatprep.mubr.bf16.mxu0 %v1987_v0  ;;  %v1925_v49 = vld [vmem:[%s2524_s3 + $0x10] sm:$0x3] }
 0x137   : > { %1375 = vmatpush1.bf16.msra.mxu1 %v1355_v51 }
 0x138   : > { %v1428_v24 = vpop.permute.xlu1 %1427  ;;  %v1426_v52 = vpop.permute.xlu0 %1425 }
 0x139   : > { %v1437_v53 = vsel %vm1429_vm10, %v1426_v52, %v1428_v24 }
 0x13a   : > { %v1451_v54 = vand.u32 %v1437_v53, %v2097_v16  ;;  %1919 = vmatmul.mubr.msk.bf16.vlgmr.msra.gmra.mxu1 %vm261_vm2, %v1917_v9 }
 0x13b   : > { %1485 = vmatprep.mubr.bf16.mxu1 %v1987_v0 }
 0x13c   : > { %v1499_v55 = vpop.permute.xlu1 %1498  ;;  %1461 = vmatprep.subr.bf16.mxu1 %v1451_v54  ;;  %v1424_v56 = vpop.permute.xlu0 %1423 }
 0x13d   : > { %v1436_v57 = vsel %vm1429_vm10, %v1424_v56, %v1426_v52  ;;  %v1927_v52 = vld [vmem:[%s2523_s2 + $0x10] sm:$0x3] }
 0x13e   : > { %v1448_v58 = vand.u32 %v1436_v57, %v2097_v16 }
 0x140   : > { %v1503_v26 = vpop.permute.xlu1 %1502  ;;  %1462 = vmatpush1.bf16.msra.mxu1 %v1448_v58  ;;  %v1501_v59 = vpop.permute.xlu0 %1500 }
 0x141   : > { %v1504_v11 = vsel %vm1429_vm10, %v1499_v55, %v1501_v59  ;;  %v1505_v60 = vsel %vm1429_vm10, %v1501_v59, %v1503_v26 }
 0x142   : > { %v1510_v61 = vsel %vm265_vm0, %v1504_v11, 0  ;;  %1923 = vmatprep.subr.msk.bf16.mxu0 %vm265_vm0, %v1505_v60 }
 0x143   : > { %1530 = vmatpush1.bf16.msra.mxu0 %v1510_v61 }
 0x144   : > { %v1422_v63 = vpop.permute.xlu1 %1421  ;;  %v1420_v1 = vpop.permute.xlu0 %1419 }
 0x145   : > { %v1435_v8 = vsel %vm1429_vm10, %v1420_v1, %v1422_v63 }
 0x146   : > { %1463 = vmatprep.subr.bf16.mxu1 %v1435_v8  ;;  %1924 = vmatmul.mubr.msk.bf16.vlgmr.msra.gmra.mxu0 %vm261_vm2, %v1922_v62 }
 0x147   : > { %1640 = vmatprep.mubr.bf16.mxu0 %v1987_v0 }
 0x148   : > { %v1583_v13 = vpop.permute.xlu1 %1582  ;;  %v1581_v14 = vpop.permute.xlu0 %1580 }
 0x149   : > { %v1592_v15 = vsel %vm1584_vm11, %v1581_v14, %v1583_v13 }
 0x14a   : > { %v1606_v17 = vand.u32 %v1592_v15, %v2097_v16 }
 0x14c   : > { %v1579_v18 = vpop.permute.xlu1 %1578  ;;  %v1418_v4 = vpop.permute.xlu0 %1417  ;;  %1616 = vmatprep.subr.bf16.mxu0 %v1606_v17 }
 0x14d   : > { %v1591_v2 = vsel %vm1584_vm11, %v1579_v18, %v1581_v14  ;;  %v1434_v19 = vsel %vm1429_vm10, %v1418_v4, %v1420_v1 }
 0x14e   : > { %v1603_v22 = vand.u32 %v1591_v2, %v2097_v16  ;;  %1464 = vmatpush1.bf16.msra.mxu1 %v1434_v19 }
 0x150   : > { %v1416_v3 = vpop.permute.xlu1 %1415  ;;  %v1414_v25 = vpop.permute.xlu0 %1413  ;;  %1617 = vmatpush1.bf16.msra.mxu0 %v1603_v22 }
 0x151   : > { %v1433_v27 = vsel %vm1429_vm10, %v1414_v25, %v1416_v3 }
 0x152   : > { %1465 = vmatprep.subr.bf16.mxu1 %v1433_v27 }
 0x154   : > { %v1575_v28 = vpop.permute.xlu1 %1574  ;;  %v1412_v29 = vpop.permute.xlu0 %1411 }
 0x155   : > { %v1432_v30 = vsel %vm1429_vm10, %v1412_v29, %v1414_v25 }
 0x156   : > { %1466 = vmatpush1.bf16.msra.mxu1 %v1432_v30 }
 0x158   : > { %v1573_v5 = vpop.permute.xlu1 %1572  ;;  %v1577_v31 = vpop.permute.xlu0 %1576 }
 0x159   : > { %v1589_v32 = vsel %vm1584_vm11, %v1573_v5, %v1575_v28  ;;  %v1590_v7 = vsel %vm1584_vm11, %v1575_v28, %v1577_v31 }
 0x15a   : > { %1618 = vmatprep.subr.bf16.mxu0 %v1590_v7 }
 0x15b   : > { %1619 = vmatpush1.bf16.msra.mxu0 %v1589_v32 }
 0x15c   : > { %v1410_v16 = vpop.permute.xlu1 %1409  ;;  %v1408_v6 = vpop.permute.xlu0 %1407 }
 0x15d   : > { %v1431_v33 = vsel %vm1429_vm10, %v1408_v6, %v1410_v16 }
 0x15e   : > { %1467 = vmatprep.subr.bf16.mxu1 %v1431_v33 }
 0x15f   : > { %v547_v34 = vpop.f32.mrf.mxu0 }
 0x160   : > { %v1569_v35 = vpop.permute.xlu1 %1568  ;;  %v1406_v36 = vpop.permute.xlu0 %1405  ;;  %v554_v12 = vadd.f32 %v547_v34, %v2389_v41 }
 0x161   : > { %v1430_v37 = vsel %vm1429_vm10, %v1406_v36, %v1408_v6  ;;  %v549_v38 = vpop.f32.mrf.mxu0 }
 0x162   : > { %1468 = vmatpush1.bf16.msra.mxu1 %v1430_v37  ;;  %v555_v40 = vadd.f32 %v549_v38, %v2401_v21 }
 0x163   : > { %v551_v20 = vpop.f32.mrf.mxu0 }
 0x164   : > { %v1567_v42 = vpop.permute.xlu1 %1566  ;;  %v1571_v10 = vpop.permute.xlu0 %1570 }
 0x165   : > { %v1587_v43 = vsel %vm1584_vm11, %v1567_v42, %v1569_v35  ;;  %1921 = vmatmul.mubr.msk.bf16.vlgmr.msra.gmra.mxu1 %vm348_vm3, %v1920_v39  ;;  %v1588_v44 = vsel %vm1584_vm11, %v1569_v35, %v1571_v10  ;;  %v552_v41 = vpop.f32.mrf.mxu0 }
 0x166   : > { %1620 = vmatprep.subr.bf16.mxu0 %v1588_v44  ;;  %1702 = vmatprep.mubr.bf16.mxu1 %v1987_v0 }
 0x167   : > { %1621 = vmatpush1.bf16.msra.mxu0 %v1587_v43 }
 0x168   : > { %v1565_v45 = vpop.permute.xlu1 %1564  ;;  %v1563_v23 = vpop.permute.xlu0 %1562 }
 0x169   : > { %v1586_v46 = vsel %vm1584_vm11, %v1563_v23, %v1565_v45 }
 0x16a   : > { %1622 = vmatprep.subr.bf16.mxu0 %v1586_v46 }
 0x16c   : > { %v1654_v21 = vpop.permute.xlu1 %1653  ;;  %v1561_v47 = vpop.permute.xlu0 %1560 }
 0x16d   : > { %v1585_v48 = vsel %vm1584_vm11, %v1561_v47, %v1563_v23 }
 0x16e   : > { %1623 = vmatpush1.bf16.msra.mxu0 %v1585_v48 }
 0x170   : > { %v1658_v50 = vpop.permute.xlu1 %1657  ;;  %v1656_v51 = vpop.permute.xlu0 %1655 }
 0x171   : > { %v1659_v9 = vsel %vm1584_vm11, %v1654_v21, %v1656_v51  ;;  %v1660_v0 = vsel %vm1584_vm11, %v1656_v51, %v1658_v50  ;;  %1926 = vmatmul.mubr.msk.bf16.vlgmr.msra.gmra.mxu0 %vm348_vm3, %v1925_v49 }
 0x172   : > { %v1665_v24 = vsel %vm265_vm0, %v1659_v9, 0  ;;  %1928 = vmatprep.subr.msk.bf16.mxu1 %vm265_vm0, %v1660_v0 }
 0x173   : > { %1685 = vmatpush1.bf16.msra.mxu1 %v1665_v24  ;;  %v619_v53 = vpop.f32.mrf.mxu1 }
 0x174   : > { %v626_v54 = vadd.f32 %v619_v53, %v554_v12 }
 0x175   : > { %v621_v55 = vpop.f32.mrf.mxu1 }
 0x176   : > { %1929 = vmatmul.mubr.msk.bf16.vlgmr.msra.gmra.mxu1 %vm261_vm2, %v1927_v52  ;;  %v627_v56 = vadd.f32 %v621_v55, %v555_v40 }
 0x177   : > { %v623_v57 = vpop.f32.mrf.mxu1 }
 0x179   : > { %v624_v58 = vpop.f32.mrf.mxu1 }
 0x17f   : > { %v712_v26 = vpop.f32.mrf.mxu0 }
 0x180   : > { %v719_v59 = vadd.f32 %v712_v26, %v626_v54 }
 0x181   : > { %v714_v11 = vpop.f32.mrf.mxu0 }
 0x182   : > { %v720_v60 = vadd.f32 %v714_v11, %v627_v56 }
 0x183   : > { %v774_v61 = vpop.f32.mrf.mxu1  ;;  %v716_v62 = vpop.f32.mrf.mxu0 }
 0x184   : > { %v781_v63 = vadd.f32 %v774_v61, %v719_v59 }
 0x185   : > { %v776_v1 = vpop.f32.mrf.mxu1  ;;  %v717_v8 = vpop.f32.mrf.mxu0 }
 0x186   : > { %v782_v13 = vadd.f32 %v776_v1, %v720_v60 }
 0x187   : > { %v778_v14 = vpop.f32.mrf.mxu1 }
 0x189   : > { %v779_v15 = vpop.f32.mrf.mxu1 }
 0x18f   : > { %v929_v17 = vpop.f32.mrf.mxu0 }
 0x191   : > { %v931_v18 = vpop.f32.mrf.mxu0 }
 0x193   : > { %v933_v4 = vpop.f32.mrf.mxu0 }
 0x195   : > { %v934_v2 = vpop.f32.mrf.mxu0 }
 0x1af   : > { %v867_v19 = vpop.f32.mrf.mxu1 }
 0x1b0   : > { %v874_v22 = vadd.f32 %v867_v19, %v781_v63 }
 0x1b1   : > { %v869_v3 = vpop.f32.mrf.mxu1 }
 0x1b2   : > { %v875_v25 = vadd.f32 %v869_v3, %v782_v13  ;;  %v936_v27 = vadd.f32 %v929_v17, %v874_v22 }
 0x1b3   : > { %v871_v28 = vpop.f32.mrf.mxu1 }
 0x1b4   : > { %v937_v29 = vadd.f32 %v931_v18, %v875_v25  ;;  %v1717_v18 = vpop.permute.xlu0 %1716 }
 0x1b5   : > { %v872_v30 = vpop.f32.mrf.mxu1 }
 0x1bb   : > { %v1022_v5 = vpop.f32.mrf.mxu0 }
 0x1bc   : > { %v1029_v31 = vadd.f32 %v1022_v5, %v936_v27 }
 0x1bd   : > { %v1024_v32 = vpop.f32.mrf.mxu0 }
 0x1be   : > { %v1030_v7 = vadd.f32 %v1024_v32, %v937_v29 }
 0x1bf   : > { %v1084_v16 = vpop.f32.mrf.mxu1  ;;  %v1026_v6 = vpop.f32.mrf.mxu0 }
 0x1c0   : > { %v1091_v33 = vadd.f32 %v1084_v16, %v1029_v31 }
 0x1c1   : > { %v1086_v34 = vpop.f32.mrf.mxu1  ;;  %v1027_v35 = vpop.f32.mrf.mxu0 }
 0x1c2   : > { %v1092_v36 = vadd.f32 %v1086_v34, %v1030_v7 }
 0x1c3   : > { %v1088_v12 = vpop.f32.mrf.mxu1 }
 0x1c5   : > { %v1089_v37 = vpop.f32.mrf.mxu1 }
 0x1ca   : > { %v1239_v38 = vpop.f32.mrf.mxu0 }
 0x1cc   : > { %v1241_v39 = vpop.f32.mrf.mxu0 }
 0x1ce   : > { %v1243_v40 = vpop.f32.mrf.mxu0 }
 0x1d0   : > { %v1244_v20 = vpop.f32.mrf.mxu0 }
 0x1e9   : > { %v1177_v42 = vpop.f32.mrf.mxu1 }
 0x1ea   : > { %v1184_v10 = vadd.f32 %v1177_v42, %v1091_v33 }
 0x1eb   : > { %v1179_v43 = vpop.f32.mrf.mxu1 }
 0x1ec   : > { %v1185_v44 = vadd.f32 %v1179_v43, %v1092_v36  ;;  %v1246_v41 = vadd.f32 %v1239_v38, %v1184_v10 }
 0x1ed   : > { %v1181_v45 = vpop.f32.mrf.mxu1 }
 0x1ee   : > { %v1247_v23 = vadd.f32 %v1241_v39, %v1185_v44 }
 0x1ef   : > { %v1182_v46 = vpop.f32.mrf.mxu1 }
 0x1f5   : > { %v1332_v21 = vpop.f32.mrf.mxu0 }
 0x1f6   : > { %v1339_v58 = vadd.f32 %v1332_v21, %v1246_v41 }
 0x1f7   : > { %v1334_v47 = vpop.f32.mrf.mxu0 }
 0x1f8   : > { %v1340_v59 = vadd.f32 %v1334_v47, %v1247_v23 }
 0x1f9   : > { %v1336_v48 = vpop.f32.mrf.mxu0 }
 0x1fa   : > { %v1394_v49 = vpop.f32.mrf.mxu1 }
 0x1fb   : > { %v1337_v50 = vpop.f32.mrf.mxu0  ;;  %v1401_v11 = vadd.f32 %v1394_v49, %v1339_v58 }
 0x1fc   : > { %v1396_v51 = vpop.f32.mrf.mxu1 }
 0x1fd   : > { %v1402_v60 = vadd.f32 %v1396_v51, %v1340_v59 }
 0x1fe   : > { %v1398_v9 = vpop.f32.mrf.mxu1 }
 0x200   : > { %v1399_v0 = vpop.f32.mrf.mxu1 }
 0x206   : > { %v1549_v24 = vpop.f32.mrf.mxu0 }
 0x208   : > { %v1551_v52 = vpop.f32.mrf.mxu0 }
 0x20a   : > { %v1553_v53 = vpop.f32.mrf.mxu0 }
 0x20c   : > { %v1554_v54 = vpop.f32.mrf.mxu0 }
 0x225   : > { %v1487_v55 = vpop.f32.mrf.mxu1 }
 0x226   : > { %v1494_v61 = vadd.f32 %v1487_v55, %v1401_v11 }
 0x227   : > { %v1489_v56 = vpop.f32.mrf.mxu1 }
 0x228   : > { %v1495_v62 = vadd.f32 %v1489_v56, %v1402_v60  ;;  %v1556_v1 = vadd.f32 %v1549_v24, %v1494_v61 }
 0x229   : > { %v1491_v57 = vpop.f32.mrf.mxu1 }
 0x22a   : > { %v1557_v14 = vadd.f32 %v1551_v52, %v1495_v62 }
 0x22b   : > { %v1492_v26 = vpop.f32.mrf.mxu1 }
 0x231   : > { %v1642_v63 = vpop.f32.mrf.mxu0 }
 0x232   : > { %v1649_v13 = vadd.f32 %v1642_v63, %v1556_v1 }
 0x233   : > { %v1644_v8 = vpop.f32.mrf.mxu0 }
 0x234   : > { %v1650_v4 = vadd.f32 %v1644_v8, %v1557_v14 }
 0x235   : > { %v1646_v15 = vpop.f32.mrf.mxu0 }
 0x236   : > { %v1704_v17 = vpop.f32.mrf.mxu1 }
 0x237   : > { %v1711_v2 = vadd.f32 %v1704_v17, %v1649_v13  ;;  %v1647_v19 = vpop.f32.mrf.mxu0 }
 0x238   : > { %v1706_v22 = vpop.f32.mrf.mxu1 }
 0x239   : > { %v1712_v3 = vadd.f32 %v1706_v22, %v1650_v4  ;;  %v1719_v25 = vadd.f32 %v1717_v18, %v1711_v2 }
 0x23a   : > { %v1708_v27 = vpop.f32.mrf.mxu1 }
 0x23b   : > { %v1720_v28 = vadd.f32 %v1717_v18, %v1712_v3  ;;  %v1723_v29 = vmul.f32 0.70710677, %v1719_v25  ;;  %v1721_v17 = vmul.f32 0.5, %v1719_v25 }
 0x23c   : > { %v1709_v30 = vpop.f32.mrf.mxu1 }
 0x23d   : > { %v1724_v5 = vmul.f32 0.70710677, %v1720_v28  ;;  %v1930_v31 = vclamps-f32 %v1723_v29, 4.0  ;;  %v1722_v18 = vmul.f32 0.5, %v1720_v28 }
 0x23f   : > { %v1931_v32 = vclamps-f32 %v1724_v5, 4.0  ;;  %v1729_v7 = vmul.f32 %v1930_v31, %v1930_v31 }
 0x241   : > { %v1730_v16 = vmul.f32 %v1931_v32, %v1931_v32  ;;  %v1747_v6 = vmul.f32 -1.1791603e-07, %v1729_v7  ;;  %v1731_v36 = vmul.f32 0.00022905065, %v1729_v7 }
 0x243   : > { %v1748_v33 = vmul.f32 -1.1791603e-07, %v1730_v16  ;;  %v1749_v34 = vadd.f32 2.3547966e-05, %v1747_v6  ;;  %v1732_v37 = vmul.f32 0.00022905065, %v1730_v16 }
 0x244   : > { %v1733_v20 = vadd.f32 0.003408291, %v1731_v36 }
 0x245   : > { %v1750_v35 = vadd.f32 2.3547966e-05, %v1748_v33  ;;  %v1751_v12 = vmul.f32 %v1749_v34, %v1729_v7  ;;  %v1734_v10 = vadd.f32 0.003408291, %v1732_v37 }
 0x246   : > { %v1735_v45 = vmul.f32 %v1733_v20, %v1729_v7 }
 0x247   : > { %v1752_v38 = vmul.f32 %v1750_v35, %v1730_v16  ;;  %v1753_v39 = vadd.f32 0.0010179626, %v1751_v12  ;;  %v1736_v46 = vmul.f32 %v1734_v10, %v1730_v16 }
 0x248   : > { %v1737_v49 = vadd.f32 0.050955694, %v1735_v45 }
 0x249   : > { %v1754_v40 = vadd.f32 0.0010179626, %v1752_v38  ;;  %v1755_v42 = vmul.f32 %v1753_v39, %v1729_v7  ;;  %v1738_v51 = vadd.f32 0.050955694, %v1736_v46 }
 0x24a   : > { %v1739_v52 = vmul.f32 %v1737_v49, %v1729_v7 }
 0x24b   : > { %v1756_v43 = vmul.f32 %v1754_v40, %v1730_v16  ;;  %v1757_v44 = vadd.f32 0.01407047, %v1755_v42  ;;  %v1740_v54 = vmul.f32 %v1738_v51, %v1730_v16 }
 0x24c   : > { %v1741_v58 = vadd.f32 0.18520832, %v1739_v52 }
 0x24d   : > { %v1758_v41 = vadd.f32 0.01407047, %v1756_v43  ;;  %v1759_v23 = vmul.f32 %v1757_v44, %v1729_v7  ;;  %v1742_v26 = vadd.f32 0.18520832, %v1740_v54 }
 0x24e   : > { %v1743_v59 = vmul.f32 %v1741_v58, %v1729_v7 }
 0x24f   : > { %v1760_v21 = vmul.f32 %v1758_v41, %v1730_v16  ;;  %v1761_v47 = vadd.f32 0.11098505, %v1759_v23  ;;  %v1744_v11 = vmul.f32 %v1742_v26, %v1730_v16 }
 0x250   : > { %v1745_v60 = vadd.f32 1.1283791, %v1743_v59 }
 0x251   : > { %v1762_v48 = vadd.f32 0.11098505, %v1760_v21  ;;  %v1763_v50 = vmul.f32 %v1761_v47, %v1729_v7  ;;  %v1746_v61 = vadd.f32 1.1283791, %v1744_v11 }
 0x252   : > { %v1771_v62 = vmul.f32 %v1930_v31, %v1745_v60 }
 0x253   : > { %v1764_v9 = vmul.f32 %v1762_v48, %v1730_v16  ;;  %v1765_v0 = vadd.f32 0.49746925, %v1763_v50  ;;  %v1772_v1 = vmul.f32 %v1931_v32, %v1746_v61 }
 0x255   : > { %v1766_v24 = vadd.f32 0.49746925, %v1764_v9  ;;  %v1767_v53 = vmul.f32 %v1765_v0, %v1729_v7 }
 0x257   : > { %v1768_v55 = vmul.f32 %v1766_v24, %v1730_v16  ;;  %v1769_v56 = vadd.f32 1.0, %v1767_v53 }
 0x259   : > { %v1770_v57 = vadd.f32 1.0, %v1768_v55  ;;  %1975 = vrcp.f32 %v1769_v56 }
 0x25b   : > { %1977 = vrcp.f32 %v1770_v57 }
 0x266   : > { %v1976_v63 = vpop.eup %1975 }
 0x267   : > { %v1774_v13 = vmul.f32 %v1976_v63, %v1771_v62 }
 0x268   : > { %v1978_v8 = vpop.eup %1977 }
 0x269   : > { %v1776_v14 = vmul.f32 %v1978_v8, %v1772_v1  ;;  %v1777_v15 = vadd.f32 1.0, %v1774_v13 }
 0x26b   : > { %v1778_v4 = vadd.f32 1.0, %v1776_v14  ;;  %v1779_v2 = vmul.f32 %v1777_v15, %v1721_v17 }
 0x26d   : > { %v1780_v19 = vmul.f32 %v1778_v4, %v1722_v18 }
 0x26f   : > { %v1783_v22 = vcombine.low %v1779_v2, %v1780_v19 }
 0x271   : > { %1785 = vst [vmem:[%s244_s6] sm:$0xff] %v1783_v22 }
 0x272 PF: > { %s15_s18 = sadd.s32 1, %s1985_s18  }
 0x273   : > { %p12_p4 = scmp.ge.s32.totalorder %s15_s18, 4  }
 0x275   :  { %14 = sbr.rel (!%p12_p4) target bundleno = 1 (0x1), region = 89 }

</bundles_post_ra>
